<compile_context>
chip_gen: v7x
topology: tpu7x:2x2x1
jax: 0.10.0
libtpu: 0.0.40
codegen_flags: <defaults>
</compile_context>

<pallas_src>
import functools

import jax
import jax.numpy as jnp
from jax.experimental import pallas as pl
from jax.experimental.pallas import tpu as pltpu


def _round_up(n, m):
    return (n + m - 1) // m * m


def _im2col(a, masks, W):
    """a: (Cp, N) f32, masks: (8, N) f32 0/1 -> (9*Cp, N).

    SAME-padding 3x3 im2col via lane rolls + precomputed border masks.  The
    batch (and any lane padding) is folded into N; rolls that cross an image
    boundary land only on lanes the masks zero out.
    """
    N = a.shape[-1]
    parts = []
    mi = 0
    for ky in range(3):
        for kx in range(3):
            if ky == 1 and kx == 1:          # centre tap: no shift, no mask
                parts.append(a)
                continue
            d = (ky - 1) * W + (kx - 1)      # flattened spatial shift
            s = pltpu.roll(a, shift=(-d) % N, axis=1)
            parts.append(s * masks[mi:mi + 1, :])
            mi += 1
    return jnp.concatenate(parts, axis=0)


def _xpre_kernel(x_ref, wx_ref, b_ref, m_ref, pre_ref, *, W, Tt):
    """Parallel pass: pre[t] = Wx @ im2col(x[t]) + b for Tt frames."""
    masks = m_ref[...]
    wx = wx_ref[...]
    b = b_ref[...]

    def step(i, carry):
        x = x_ref[i].astype(jnp.float32)                       # (Cp, N)
        x_col = _im2col(x, masks, W)                           # (9Cp, N)
        pre_ref[i] = jnp.dot(wx, x_col,
                             preferred_element_type=jnp.float32) + b
        return carry

    jax.lax.fori_loop(0, Tt, step, 0, unroll=True)


def _gru_kernel(pre_ref, h0_ref, whi_ref, whh_ref, m_ref, o_ref, h_state,
                *, W, Cp, Tt):
    """Serial recurrence: only the h-dependent work is on the T path."""
    tb = pl.program_id(0)

    @pl.when(tb == 0)
    def _():
        h_state[...] = h0_ref[...].astype(jnp.float32)

    masks = m_ref[...]
    whi = whi_ref[...]
    whh = whh_ref[...]

    def step(i, carry):
        h = h_state[...]                                       # (Cp, N) f32
        pre = pre_ref[i]                                       # (3Cp, N) f32

        h_col = _im2col(h, masks, W)
        hih = jnp.dot(whi, h_col, preferred_element_type=jnp.float32)
        rz = jax.nn.sigmoid(pre[:2 * Cp] + hih)                # gates r, z
        r = rz[:Cp]
        z = rz[Cp:]

        rh_col = _im2col(r * h, masks, W)
        chh = jnp.dot(whh, rh_col, preferred_element_type=jnp.float32)
        c = jnp.tanh(pre[2 * Cp:] + chh)                       # candidate

        h_new = (1.0 - z) * h + z * c
        h_state[...] = h_new
        o_ref[i] = h_new.astype(o_ref.dtype)
        return carry

    jax.lax.fori_loop(0, Tt, step, 0, unroll=True)


def _convgru_series(x, h0, w_ih, b_ih, w_hh, b_hh, *, t_block=4):
    """x: (B, T, H, W, C) NHWC, h0: (B, H, W, C) -> o: (B, T, H, W, C)."""
    B, T, H, W, C = x.shape
    HW = H * W
    BHW = B * HW
    N = _round_up(BHW, 128)           # lane-dense width: batch folded in lanes
    Cp = _round_up(C, 8)              # sublane-aligned channels
    Tt = max(1, min(t_block, T))      # timesteps per grid step
    Tb = (T + Tt - 1) // Tt
    Tp = Tb * Tt
    f32 = jnp.float32
    out_dtype = x.dtype

    # ---- activations: NHWC -> channel-major, batch folded into lanes -------
    # x[b,t,y,xx,c] -> x_l[t, c, b*HW + y*W + xx]
    x_l = jnp.transpose(x, (1, 4, 0, 2, 3)).reshape(T, C, BHW)
    x_l = jnp.pad(x_l, ((0, Tp - T), (0, Cp - C), (0, N - BHW)))
    h_l = jnp.transpose(h0, (3, 0, 1, 2)).reshape(C, BHW)
    h_l = jnp.pad(h_l, ((0, Cp - C), (0, N - BHW)))

    # ---- precomputed border masks for the 8 non-centre taps ----------------
    lane = jnp.arange(N)
    valid = lane < BHW
    pix = lane % HW
    yy = pix // W
    xx = pix % W
    rows = []
    for ky in range(3):
        for kx in range(3):
            if ky == 1 and kx == 1:
                continue
            dy, dx = ky - 1, kx - 1
            m = valid
            if dy < 0:
                m = m & (yy >= -dy)
            elif dy > 0:
                m = m & (yy < H - dy)
            if dx < 0:
                m = m & (xx >= -dx)
            elif dx > 0:
                m = m & (xx < W - dx)
            rows.append(m)
    masks = jnp.stack(rows, axis=0).astype(f32)                # (8, N)

    # ---- weight packing (HWIO -> (Cout, 9*Cp) row-major over taps) ---------
    w_ih = w_ih.astype(f32)
    w_hh = w_hh.astype(f32)
    b_ih = b_ih.astype(f32)
    b_hh = b_hh.astype(f32)

    def pack(w):  # (3,3,C,C) -> (Cp, 9*Cp); cols ordered (tap, Cin)
        w = jnp.pad(w, ((0, 0), (0, 0), (0, Cp - C), (0, Cp - w.shape[3])))
        return jnp.transpose(w, (3, 0, 1, 2)).reshape(Cp, 9 * Cp)

    wx = jnp.concatenate([pack(w_ih[:, :, :C, :C]),       # r <- x
                          pack(w_ih[:, :, :C, C:]),       # z <- x
                          pack(w_hh[:, :, :C, :])], 0)    # c <- x   (3Cp,9Cp)
    whi = jnp.concatenate([pack(w_ih[:, :, C:, :C]),      # r <- h
                           pack(w_ih[:, :, C:, C:])], 0)  # z <- h   (2Cp,9Cp)
    whh = pack(w_hh[:, :, C:, :])                         # c <- r*h (Cp,9Cp)
    bias = jnp.concatenate([jnp.pad(b_ih[:C], (0, Cp - C)),
                            jnp.pad(b_ih[C:], (0, Cp - C)),
                            jnp.pad(b_hh, (0, Cp - C))]).reshape(3 * Cp, 1)

    # ---- pass 1: x-only contribution of BOTH convs, parallel over T --------
    pre = pl.pallas_call(
        functools.partial(_xpre_kernel, W=W, Tt=Tt),
        out_shape=jax.ShapeDtypeStruct((Tp, 3 * Cp, N), f32),
        grid_spec=pltpu.PrefetchScalarGridSpec(
            num_scalar_prefetch=0,
            grid=(Tb,),
            in_specs=[
                pl.BlockSpec((Tt, Cp, N), lambda t: (t, 0, 0)),       # x
                pl.BlockSpec((3 * Cp, 9 * Cp), lambda t: (0, 0)),     # Wx
                pl.BlockSpec((3 * Cp, 1), lambda t: (0, 0)),          # bias
                pl.BlockSpec((8, N), lambda t: (0, 0)),               # masks
            ],
            out_specs=pl.BlockSpec((Tt, 3 * Cp, N), lambda t: (t, 0, 0)),
        ),
        compiler_params=pltpu.CompilerParams(
            dimension_semantics=("parallel",),
            vmem_limit_bytes=64 * 1024 * 1024),
    )(x_l, wx, bias, masks)

    # ---- pass 2: serial GRU recurrence, h resident in VMEM scratch ---------
    out = pl.pallas_call(
        functools.partial(_gru_kernel, W=W, Cp=Cp, Tt=Tt),
        out_shape=jax.ShapeDtypeStruct((Tp, Cp, N), out_dtype),
        grid_spec=pltpu.PrefetchScalarGridSpec(
            num_scalar_prefetch=0,
            grid=(Tb,),
            in_specs=[
                pl.BlockSpec((Tt, 3 * Cp, N), lambda t: (t, 0, 0)),   # pre
                pl.BlockSpec((Cp, N), lambda t: (0, 0)),              # h0
                pl.BlockSpec((2 * Cp, 9 * Cp), lambda t: (0, 0)),     # Whi
                pl.BlockSpec((Cp, 9 * Cp), lambda t: (0, 0)),         # Whh
                pl.BlockSpec((8, N), lambda t: (0, 0)),               # masks
            ],
            out_specs=pl.BlockSpec((Tt, Cp, N), lambda t: (t, 0, 0)),
            scratch_shapes=[pltpu.VMEM((Cp, N), jnp.float32)],        # h state
        ),
        compiler_params=pltpu.CompilerParams(
            dimension_semantics=("arbitrary",),
            vmem_limit_bytes=64 * 1024 * 1024),
    )(pre, h_l, whi, whh, masks)

    # ---- back to NHWC, dropping T / channel / lane padding ------------------
    o = out[:T, :, :BHW].reshape(T, Cp, B, H, W)[:, :C]
    return jnp.transpose(o, (2, 0, 3, 4, 1)).astype(x.dtype)


def convgru_forward(x, h, params):
    """Mirrors ConvGRU.forward: 5-D x -> time series, 4-D x -> single frame."""
    w_ih, b_ih, w_hh, b_hh = params
    single = x.ndim == 4
    xt = x[:, None] if single else x
    if h is None:
        h = jnp.zeros(xt.shape[:1] + xt.shape[2:], xt.dtype)
    o = _convgru_series(xt, h, w_ih, b_ih, w_hh, b_hh)
    h_final = o[:, -1]
    if single:
        return h_final, h_final
    return o, h_final


# ---------------- pure-JAX reference (for correctness check) ----------------
def _reference_forward(x, h, params):
    w_ih, b_ih, w_hh, b_hh = params

    def conv(inp, w, b):
        return jax.lax.conv_general_dilated(
            inp, w, (1, 1), "SAME",
            dimension_numbers=("NHWC", "HWIO", "NHWC")) + b

    def cell(x_t, h_t):
        rz = jax.nn.sigmoid(conv(jnp.concatenate([x_t, h_t], -1), w_ih, b_ih))
        r, z = jnp.split(rz, 2, axis=-1)
        c = jnp.tanh(conv(jnp.concatenate([x_t, r * h_t], -1), w_hh, b_hh))
        return (1.0 - z) * h_t + z * c

    if x.ndim == 5:
        if h is None:
            h = jnp.zeros((x.shape[0],) + x.shape[2:], x.dtype)
        outs = []
        for t in range(x.shape[1]):
            h = cell(x[:, t], h)
            outs.append(h)
        return jnp.stack(outs, 1), h
    if h is None:
        h = jnp.zeros_like(x)
    h = cell(x, h)
    return h, h


if __name__ == "__main__":
    B, T, H, W, C = 2, 6, 16, 16, 4          # T=6 exercises the Tt=4 blocking
    key = jax.random.PRNGKey(0)
    k1, k2, k3, k4, k5, k6 = jax.random.split(key, 6)

    # deterministic synthetic inputs / parameters (shapes from ConvGRU.__init__)
    x = jax.random.normal(k1, (B, T, H, W, C), jnp.float32)
    w_ih = 0.1 * jax.random.normal(k2, (3, 3, 2 * C, 2 * C), jnp.float32)
    b_ih = 0.1 * jax.random.normal(k3, (2 * C,), jnp.float32)
    w_hh = 0.1 * jax.random.normal(k4, (3, 3, 2 * C, C), jnp.float32)
    b_hh = 0.1 * jax.random.normal(k5, (C,), jnp.float32)
    h0 = jax.random.normal(k6, (B, H, W, C), jnp.float32)
    params = (w_ih, b_ih, w_hh, b_hh)

    # time-series path, h=None (zeros init, like the PyTorch module)
    o, h_final = convgru_forward(x, None, params)
    jax.block_until_ready((o, h_final))
    o_ref, h_ref = _reference_forward(x, None, params)
    assert o.shape == (B, T, H, W, C) and h_final.shape == (B, H, W, C)
    assert jnp.allclose(o, o_ref, atol=2e-3, rtol=2e-3)
    assert jnp.allclose(h_final, h_ref, atol=2e-3, rtol=2e-3)

    # time-series path with a provided initial hidden state
    o2, h2 = convgru_forward(x, h0, params)
    jax.block_until_ready((o2, h2))
    o2_ref, h2_ref = _reference_forward(x, h0, params)
    assert jnp.allclose(o2, o2_ref, atol=2e-3, rtol=2e-3)
    assert jnp.allclose(h2, h2_ref, atol=2e-3, rtol=2e-3)

    # single-frame path
    o1, h1 = convgru_forward(x[:, 0], None, params)
    jax.block_until_ready((o1, h1))
    o1_ref, h1_ref = _reference_forward(x[:, 0], None, params)
    assert jnp.allclose(o1, o1_ref, atol=2e-3, rtol=2e-3)
    assert jnp.allclose(h1, h1_ref, atol=2e-3, rtol=2e-3)

    print("KERNEL_OK")
</pallas_src>

<mosaic_0001>
module attributes {stable_mosaic.version = 11 : i64} {
  func.func @_xpre_kernel(%arg0: i32, %arg1: memref<4x8x512xf32, #tpu.memory_space<vmem>>, %arg2: memref<24x72xf32, #tpu.memory_space<vmem>>, %arg3: memref<24x1xf32, #tpu.memory_space<vmem>>, %arg4: memref<8x512xf32, #tpu.memory_space<vmem>>, %arg5: memref<4x24x512xf32, #tpu.memory_space<vmem>>) attributes {dimension_semantics = [#tpu.dimension_semantics<parallel>], iteration_bounds = array<i64: 2>, scalar_prefetch = 0 : i64, scratch_operands = 0 : i64, tpu.core_type = #tpu.core_type<tc>, window_params = [{transform_indices = @transform_0, window_bounds = array<i64: 4, 8, 512>}, {pipeline_mode = #tpu.pipeline_mode<synchronous>, transform_indices = @transform_1, window_bounds = array<i64: 24, 72>}, {pipeline_mode = #tpu.pipeline_mode<synchronous>, transform_indices = @transform_2, window_bounds = array<i64: 24, 1>}, {pipeline_mode = #tpu.pipeline_mode<synchronous>, transform_indices = @transform_3, window_bounds = array<i64: 8, 512>}, {transform_indices = @transform_4, window_bounds = array<i64: 4, 24, 512>}]} {
    %c0 = arith.constant 0 : index
    %c0_0 = arith.constant 0 : index
    %0 = vector.load %arg4[%c0, %c0_0] : memref<8x512xf32, #tpu.memory_space<vmem>>, vector<8x512xf32>
    %c0_1 = arith.constant 0 : index
    %c0_2 = arith.constant 0 : index
    %1 = vector.load %arg2[%c0_1, %c0_2] : memref<24x72xf32, #tpu.memory_space<vmem>>, vector<24x72xf32>
    %c0_3 = arith.constant 0 : index
    %c0_4 = arith.constant 0 : index
    %2 = vector.load %arg3[%c0_3, %c0_4] : memref<24x1xf32, #tpu.memory_space<vmem>>, vector<24x1xf32>
    %c0_i32 = arith.constant 0 : i32
    %3 = arith.index_cast %c0_i32 : i32 to index
    %c0_5 = arith.constant 0 : index
    %c0_6 = arith.constant 0 : index
    %4 = vector.load %arg1[%3, %c0_5, %c0_6] : memref<4x8x512xf32, #tpu.memory_space<vmem>>, vector<1x8x512xf32>
    %5 = vector.shape_cast %4 : vector<1x8x512xf32> to vector<8x512xf32>
    %c17_i32 = arith.constant 17 : i32
    %6 = tpu.dynamic_rotate %5 by %c17_i32 dim 1 : vector<8x512xf32>, i32 -> vector<8x512xf32>
    %7 = vector.extract_strided_slice %0 {offsets = [0, 0], sizes = [1, 512], strides = [1, 1]} : vector<8x512xf32> to vector<1x512xf32>
    %8 = vector.broadcast %7 : vector<1x512xf32> to vector<8x512xf32>
    %9 = arith.mulf %6, %8 : vector<8x512xf32>
    %c16_i32 = arith.constant 16 : i32
    %10 = tpu.dynamic_rotate %5 by %c16_i32 dim 1 : vector<8x512xf32>, i32 -> vector<8x512xf32>
    %11 = vector.extract_strided_slice %0 {offsets = [1, 0], sizes = [1, 512], strides = [1, 1]} : vector<8x512xf32> to vector<1x512xf32>
    %12 = vector.broadcast %11 : vector<1x512xf32> to vector<8x512xf32>
    %13 = arith.mulf %10, %12 : vector<8x512xf32>
    %c15_i32 = arith.constant 15 : i32
    %14 = tpu.dynamic_rotate %5 by %c15_i32 dim 1 : vector<8x512xf32>, i32 -> vector<8x512xf32>
    %15 = vector.extract_strided_slice %0 {offsets = [2, 0], sizes = [1, 512], strides = [1, 1]} : vector<8x512xf32> to vector<1x512xf32>
    %16 = vector.broadcast %15 : vector<1x512xf32> to vector<8x512xf32>
    %17 = arith.mulf %14, %16 : vector<8x512xf32>
    %c1_i32 = arith.constant 1 : i32
    %18 = tpu.dynamic_rotate %5 by %c1_i32 dim 1 : vector<8x512xf32>, i32 -> vector<8x512xf32>
    %19 = vector.extract_strided_slice %0 {offsets = [3, 0], sizes = [1, 512], strides = [1, 1]} : vector<8x512xf32> to vector<1x512xf32>
    %20 = vector.broadcast %19 : vector<1x512xf32> to vector<8x512xf32>
    %21 = arith.mulf %18, %20 : vector<8x512xf32>
    %c511_i32 = arith.constant 511 : i32
    %22 = tpu.dynamic_rotate %5 by %c511_i32 dim 1 : vector<8x512xf32>, i32 -> vector<8x512xf32>
    %23 = vector.extract_strided_slice %0 {offsets = [4, 0], sizes = [1, 512], strides = [1, 1]} : vector<8x512xf32> to vector<1x512xf32>
    %24 = vector.broadcast %23 : vector<1x512xf32> to vector<8x512xf32>
    %25 = arith.mulf %22, %24 : vector<8x512xf32>
    %c497_i32 = arith.constant 497 : i32
    %26 = tpu.dynamic_rotate %5 by %c497_i32 dim 1 : vector<8x512xf32>, i32 -> vector<8x512xf32>
    %27 = vector.extract_strided_slice %0 {offsets = [5, 0], sizes = [1, 512], strides = [1, 1]} : vector<8x512xf32> to vector<1x512xf32>
    %28 = vector.broadcast %27 : vector<1x512xf32> to vector<8x512xf32>
    %29 = arith.mulf %26, %28 : vector<8x512xf32>
    %c496_i32 = arith.constant 496 : i32
    %30 = tpu.dynamic_rotate %5 by %c496_i32 dim 1 : vector<8x512xf32>, i32 -> vector<8x512xf32>
    %31 = vector.extract_strided_slice %0 {offsets = [6, 0], sizes = [1, 512], strides = [1, 1]} : vector<8x512xf32> to vector<1x512xf32>
    %32 = vector.broadcast %31 : vector<1x512xf32> to vector<8x512xf32>
    %33 = arith.mulf %30, %32 : vector<8x512xf32>
    %c495_i32 = arith.constant 495 : i32
    %34 = tpu.dynamic_rotate %5 by %c495_i32 dim 1 : vector<8x512xf32>, i32 -> vector<8x512xf32>
    %35 = vector.extract_strided_slice %0 {offsets = [7, 0], sizes = [1, 512], strides = [1, 1]} : vector<8x512xf32> to vector<1x512xf32>
    %36 = vector.broadcast %35 : vector<1x512xf32> to vector<8x512xf32>
    %37 = arith.mulf %34, %36 : vector<8x512xf32>
    %38 = tpu.concatenate %9, %13, %17, %21, %5, %25, %29, %33, %37 in 0 : vector<8x512xf32>, vector<8x512xf32>, vector<8x512xf32>, vector<8x512xf32>, vector<8x512xf32>, vector<8x512xf32>, vector<8x512xf32>, vector<8x512xf32>, vector<8x512xf32> -> vector<72x512xf32>
    %cst = arith.constant dense<0.000000e+00> : vector<24x512xf32>
    %39 = tpu.matmul %1, %38, %cst {dimension_numbers = #tpu.dot_dimension_numbers<[1], [0], [0], [1], [0, 0, 1, 1], [], []>} : vector<24x72xf32>, vector<72x512xf32>, vector<24x512xf32> -> vector<24x512xf32>
    %40 = vector.broadcast %2 : vector<24x1xf32> to vector<24x512xf32>
    %41 = arith.addf %39, %40 : vector<24x512xf32>
    %42 = arith.index_cast %c0_i32 : i32 to index
    %c0_7 = arith.constant 0 : index
    %c0_8 = arith.constant 0 : index
    %43 = vector.load %arg5[%42, %c0_7, %c0_8] : memref<4x24x512xf32, #tpu.memory_space<vmem>>, vector<1x24x512xf32>
    %44 = vector.shape_cast %43 : vector<1x24x512xf32> to vector<24x512xf32>
    %45 = vector.shape_cast %41 : vector<24x512xf32> to vector<1x24x512xf32>
    tpu.vector_store %arg5[%42, %c0_7, %c0_8], %45 {strides = array<i32>} : memref<4x24x512xf32, #tpu.memory_space<vmem>>, vector<1x24x512xf32>,
    %c1_i32_9 = arith.constant 1 : i32
    %46 = arith.index_cast %c1_i32_9 : i32 to index
    %c0_10 = arith.constant 0 : index
    %c0_11 = arith.constant 0 : index
    %47 = vector.load %arg1[%46, %c0_10, %c0_11] : memref<4x8x512xf32, #tpu.memory_space<vmem>>, vector<1x8x512xf32>
    %48 = vector.shape_cast %47 : vector<1x8x512xf32> to vector<8x512xf32>
    %c17_i32_12 = arith.constant 17 : i32
    %49 = tpu.dynamic_rotate %48 by %c17_i32_12 dim 1 : vector<8x512xf32>, i32 -> vector<8x512xf32>
    %50 = vector.extract_strided_slice %0 {offsets = [0, 0], sizes = [1, 512], strides = [1, 1]} : vector<8x512xf32> to vector<1x512xf32>
    %51 = vector.broadcast %50 : vector<1x512xf32> to vector<8x512xf32>
    %52 = arith.mulf %49, %51 : vector<8x512xf32>
    %c16_i32_13 = arith.constant 16 : i32
    %53 = tpu.dynamic_rotate %48 by %c16_i32_13 dim 1 : vector<8x512xf32>, i32 -> vector<8x512xf32>
    %54 = vector.extract_strided_slice %0 {offsets = [1, 0], sizes = [1, 512], strides = [1, 1]} : vector<8x512xf32> to vector<1x512xf32>
    %55 = vector.broadcast %54 : vector<1x512xf32> to vector<8x512xf32>
    %56 = arith.mulf %53, %55 : vector<8x512xf32>
    %c15_i32_14 = arith.constant 15 : i32
    %57 = tpu.dynamic_rotate %48 by %c15_i32_14 dim 1 : vector<8x512xf32>, i32 -> vector<8x512xf32>
    %58 = vector.extract_strided_slice %0 {offsets = [2, 0], sizes = [1, 512], strides = [1, 1]} : vector<8x512xf32> to vector<1x512xf32>
    %59 = vector.broadcast %58 : vector<1x512xf32> to vector<8x512xf32>
    %60 = arith.mulf %57, %59 : vector<8x512xf32>
    %c1_i32_15 = arith.constant 1 : i32
    %61 = tpu.dynamic_rotate %48 by %c1_i32_15 dim 1 : vector<8x512xf32>, i32 -> vector<8x512xf32>
    %62 = vector.extract_strided_slice %0 {offsets = [3, 0], sizes = [1, 512], strides = [1, 1]} : vector<8x512xf32> to vector<1x512xf32>
    %63 = vector.broadcast %62 : vector<1x512xf32> to vector<8x512xf32>
    %64 = arith.mulf %61, %63 : vector<8x512xf32>
    %c511_i32_16 = arith.constant 511 : i32
    %65 = tpu.dynamic_rotate %48 by %c511_i32_16 dim 1 : vector<8x512xf32>, i32 -> vector<8x512xf32>
    %66 = vector.extract_strided_slice %0 {offsets = [4, 0], sizes = [1, 512], strides = [1, 1]} : vector<8x512xf32> to vector<1x512xf32>
    %67 = vector.broadcast %66 : vector<1x512xf32> to vector<8x512xf32>
    %68 = arith.mulf %65, %67 : vector<8x512xf32>
    %c497_i32_17 = arith.constant 497 : i32
    %69 = tpu.dynamic_rotate %48 by %c497_i32_17 dim 1 : vector<8x512xf32>, i32 -> vector<8x512xf32>
    %70 = vector.extract_strided_slice %0 {offsets = [5, 0], sizes = [1, 512], strides = [1, 1]} : vector<8x512xf32> to vector<1x512xf32>
    %71 = vector.broadcast %70 : vector<1x512xf32> to vector<8x512xf32>
    %72 = arith.mulf %69, %71 : vector<8x512xf32>
    %c496_i32_18 = arith.constant 496 : i32
    %73 = tpu.dynamic_rotate %48 by %c496_i32_18 dim 1 : vector<8x512xf32>, i32 -> vector<8x512xf32>
    %74 = vector.extract_strided_slice %0 {offsets = [6, 0], sizes = [1, 512], strides = [1, 1]} : vector<8x512xf32> to vector<1x512xf32>
    %75 = vector.broadcast %74 : vector<1x512xf32> to vector<8x512xf32>
    %76 = arith.mulf %73, %75 : vector<8x512xf32>
    %c495_i32_19 = arith.constant 495 : i32
    %77 = tpu.dynamic_rotate %48 by %c495_i32_19 dim 1 : vector<8x512xf32>, i32 -> vector<8x512xf32>
    %78 = vector.extract_strided_slice %0 {offsets = [7, 0], sizes = [1, 512], strides = [1, 1]} : vector<8x512xf32> to vector<1x512xf32>
    %79 = vector.broadcast %78 : vector<1x512xf32> to vector<8x512xf32>
    %80 = arith.mulf %77, %79 : vector<8x512xf32>
    %81 = tpu.concatenate %52, %56, %60, %64, %48, %68, %72, %76, %80 in 0 : vector<8x512xf32>, vector<8x512xf32>, vector<8x512xf32>, vector<8x512xf32>, vector<8x512xf32>, vector<8x512xf32>, vector<8x512xf32>, vector<8x512xf32>, vector<8x512xf32> -> vector<72x512xf32>
    %cst_20 = arith.constant dense<0.000000e+00> : vector<24x512xf32>
    %82 = tpu.matmul %1, %81, %cst_20 {dimension_numbers = #tpu.dot_dimension_numbers<[1], [0], [0], [1], [0, 0, 1, 1], [], []>} : vector<24x72xf32>, vector<72x512xf32>, vector<24x512xf32> -> vector<24x512xf32>
    %83 = vector.broadcast %2 : vector<24x1xf32> to vector<24x512xf32>
    %84 = arith.addf %82, %83 : vector<24x512xf32>
    %85 = arith.index_cast %c1_i32_9 : i32 to index
    %c0_21 = arith.constant 0 : index
    %c0_22 = arith.constant 0 : index
    %86 = vector.load %arg5[%85, %c0_21, %c0_22] : memref<4x24x512xf32, #tpu.memory_space<vmem>>, vector<1x24x512xf32>
    %87 = vector.shape_cast %86 : vector<1x24x512xf32> to vector<24x512xf32>
    %88 = vector.shape_cast %84 : vector<24x512xf32> to vector<1x24x512xf32>
    tpu.vector_store %arg5[%85, %c0_21, %c0_22], %88 {strides = array<i32>} : memref<4x24x512xf32, #tpu.memory_space<vmem>>, vector<1x24x512xf32>,
    %c2_i32 = arith.constant 2 : i32
    %89 = arith.index_cast %c2_i32 : i32 to index
    %c0_23 = arith.constant 0 : index
    %c0_24 = arith.constant 0 : index
    %90 = vector.load %arg1[%89, %c0_23, %c0_24] : memref<4x8x512xf32, #tpu.memory_space<vmem>>, vector<1x8x512xf32>
    %91 = vector.shape_cast %90 : vector<1x8x512xf32> to vector<8x512xf32>
    %c17_i32_25 = arith.constant 17 : i32
    %92 = tpu.dynamic_rotate %91 by %c17_i32_25 dim 1 : vector<8x512xf32>, i32 -> vector<8x512xf32>
    %93 = vector.extract_strided_slice %0 {offsets = [0, 0], sizes = [1, 512], strides = [1, 1]} : vector<8x512xf32> to vector<1x512xf32>
    %94 = vector.broadcast %93 : vector<1x512xf32> to vector<8x512xf32>
    %95 = arith.mulf %92, %94 : vector<8x512xf32>
    %c16_i32_26 = arith.constant 16 : i32
    %96 = tpu.dynamic_rotate %91 by %c16_i32_26 dim 1 : vector<8x512xf32>, i32 -> vector<8x512xf32>
    %97 = vector.extract_strided_slice %0 {offsets = [1, 0], sizes = [1, 512], strides = [1, 1]} : vector<8x512xf32> to vector<1x512xf32>
    %98 = vector.broadcast %97 : vector<1x512xf32> to vector<8x512xf32>
    %99 = arith.mulf %96, %98 : vector<8x512xf32>
    %c15_i32_27 = arith.constant 15 : i32
    %100 = tpu.dynamic_rotate %91 by %c15_i32_27 dim 1 : vector<8x512xf32>, i32 -> vector<8x512xf32>
    %101 = vector.extract_strided_slice %0 {offsets = [2, 0], sizes = [1, 512], strides = [1, 1]} : vector<8x512xf32> to vector<1x512xf32>
    %102 = vector.broadcast %101 : vector<1x512xf32> to vector<8x512xf32>
    %103 = arith.mulf %100, %102 : vector<8x512xf32>
    %c1_i32_28 = arith.constant 1 : i32
    %104 = tpu.dynamic_rotate %91 by %c1_i32_28 dim 1 : vector<8x512xf32>, i32 -> vector<8x512xf32>
    %105 = vector.extract_strided_slice %0 {offsets = [3, 0], sizes = [1, 512], strides = [1, 1]} : vector<8x512xf32> to vector<1x512xf32>
    %106 = vector.broadcast %105 : vector<1x512xf32> to vector<8x512xf32>
    %107 = arith.mulf %104, %106 : vector<8x512xf32>
    %c511_i32_29 = arith.constant 511 : i32
    %108 = tpu.dynamic_rotate %91 by %c511_i32_29 dim 1 : vector<8x512xf32>, i32 -> vector<8x512xf32>
    %109 = vector.extract_strided_slice %0 {offsets = [4, 0], sizes = [1, 512], strides = [1, 1]} : vector<8x512xf32> to vector<1x512xf32>
    %110 = vector.broadcast %109 : vector<1x512xf32> to vector<8x512xf32>
    %111 = arith.mulf %108, %110 : vector<8x512xf32>
    %c497_i32_30 = arith.constant 497 : i32
    %112 = tpu.dynamic_rotate %91 by %c497_i32_30 dim 1 : vector<8x512xf32>, i32 -> vector<8x512xf32>
    %113 = vector.extract_strided_slice %0 {offsets = [5, 0], sizes = [1, 512], strides = [1, 1]} : vector<8x512xf32> to vector<1x512xf32>
    %114 = vector.broadcast %113 : vector<1x512xf32> to vector<8x512xf32>
    %115 = arith.mulf %112, %114 : vector<8x512xf32>
    %c496_i32_31 = arith.constant 496 : i32
    %116 = tpu.dynamic_rotate %91 by %c496_i32_31 dim 1 : vector<8x512xf32>, i32 -> vector<8x512xf32>
    %117 = vector.extract_strided_slice %0 {offsets = [6, 0], sizes = [1, 512], strides = [1, 1]} : vector<8x512xf32> to vector<1x512xf32>
    %118 = vector.broadcast %117 : vector<1x512xf32> to vector<8x512xf32>
    %119 = arith.mulf %116, %118 : vector<8x512xf32>
    %c495_i32_32 = arith.constant 495 : i32
    %120 = tpu.dynamic_rotate %91 by %c495_i32_32 dim 1 : vector<8x512xf32>, i32 -> vector<8x512xf32>
    %121 = vector.extract_strided_slice %0 {offsets = [7, 0], sizes = [1, 512], strides = [1, 1]} : vector<8x512xf32> to vector<1x512xf32>
    %122 = vector.broadcast %121 : vector<1x512xf32> to vector<8x512xf32>
    %123 = arith.mulf %120, %122 : vector<8x512xf32>
    %124 = tpu.concatenate %95, %99, %103, %107, %91, %111, %115, %119, %123 in 0 : vector<8x512xf32>, vector<8x512xf32>, vector<8x512xf32>, vector<8x512xf32>, vector<8x512xf32>, vector<8x512xf32>, vector<8x512xf32>, vector<8x512xf32>, vector<8x512xf32> -> vector<72x512xf32>
    %cst_33 = arith.constant dense<0.000000e+00> : vector<24x512xf32>
    %125 = tpu.matmul %1, %124, %cst_33 {dimension_numbers = #tpu.dot_dimension_numbers<[1], [0], [0], [1], [0, 0, 1, 1], [], []>} : vector<24x72xf32>, vector<72x512xf32>, vector<24x512xf32> -> vector<24x512xf32>
    %126 = vector.broadcast %2 : vector<24x1xf32> to vector<24x512xf32>
    %127 = arith.addf %125, %126 : vector<24x512xf32>
    %128 = arith.index_cast %c2_i32 : i32 to index
    %c0_34 = arith.constant 0 : index
    %c0_35 = arith.constant 0 : index
    %129 = vector.load %arg5[%128, %c0_34, %c0_35] : memref<4x24x512xf32, #tpu.memory_space<vmem>>, vector<1x24x512xf32>
    %130 = vector.shape_cast %129 : vector<1x24x512xf32> to vector<24x512xf32>
    %131 = vector.shape_cast %127 : vector<24x512xf32> to vector<1x24x512xf32>
    tpu.vector_store %arg5[%128, %c0_34, %c0_35], %131 {strides = array<i32>} : memref<4x24x512xf32, #tpu.memory_space<vmem>>, vector<1x24x512xf32>,
    %c3_i32 = arith.constant 3 : i32
    %132 = arith.index_cast %c3_i32 : i32 to index
    %c0_36 = arith.constant 0 : index
    %c0_37 = arith.constant 0 : index
    %133 = vector.load %arg1[%132, %c0_36, %c0_37] : memref<4x8x512xf32, #tpu.memory_space<vmem>>, vector<1x8x512xf32>
    %134 = vector.shape_cast %133 : vector<1x8x512xf32> to vector<8x512xf32>
    %c17_i32_38 = arith.constant 17 : i32
    %135 = tpu.dynamic_rotate %134 by %c17_i32_38 dim 1 : vector<8x512xf32>, i32 -> vector<8x512xf32>
    %136 = vector.extract_strided_slice %0 {offsets = [0, 0], sizes = [1, 512], strides = [1, 1]} : vector<8x512xf32> to vector<1x512xf32>
    %137 = vector.broadcast %136 : vector<1x512xf32> to vector<8x512xf32>
    %138 = arith.mulf %135, %137 : vector<8x512xf32>
    %c16_i32_39 = arith.constant 16 : i32
    %139 = tpu.dynamic_rotate %134 by %c16_i32_39 dim 1 : vector<8x512xf32>, i32 -> vector<8x512xf32>
    %140 = vector.extract_strided_slice %0 {offsets = [1, 0], sizes = [1, 512], strides = [1, 1]} : vector<8x512xf32> to vector<1x512xf32>
    %141 = vector.broadcast %140 : vector<1x512xf32> to vector<8x512xf32>
    %142 = arith.mulf %139, %141 : vector<8x512xf32>
    %c15_i32_40 = arith.constant 15 : i32
    %143 = tpu.dynamic_rotate %134 by %c15_i32_40 dim 1 : vector<8x512xf32>, i32 -> vector<8x512xf32>
    %144 = vector.extract_strided_slice %0 {offsets = [2, 0], sizes = [1, 512], strides = [1, 1]} : vector<8x512xf32> to vector<1x512xf32>
    %145 = vector.broadcast %144 : vector<1x512xf32> to vector<8x512xf32>
    %146 = arith.mulf %143, %145 : vector<8x512xf32>
    %c1_i32_41 = arith.constant 1 : i32
    %147 = tpu.dynamic_rotate %134 by %c1_i32_41 dim 1 : vector<8x512xf32>, i32 -> vector<8x512xf32>
    %148 = vector.extract_strided_slice %0 {offsets = [3, 0], sizes = [1, 512], strides = [1, 1]} : vector<8x512xf32> to vector<1x512xf32>
    %149 = vector.broadcast %148 : vector<1x512xf32> to vector<8x512xf32>
    %150 = arith.mulf %147, %149 : vector<8x512xf32>
    %c511_i32_42 = arith.constant 511 : i32
    %151 = tpu.dynamic_rotate %134 by %c511_i32_42 dim 1 : vector<8x512xf32>, i32 -> vector<8x512xf32>
    %152 = vector.extract_strided_slice %0 {offsets = [4, 0], sizes = [1, 512], strides = [1, 1]} : vector<8x512xf32> to vector<1x512xf32>
    %153 = vector.broadcast %152 : vector<1x512xf32> to vector<8x512xf32>
    %154 = arith.mulf %151, %153 : vector<8x512xf32>
    %c497_i32_43 = arith.constant 497 : i32
    %155 = tpu.dynamic_rotate %134 by %c497_i32_43 dim 1 : vector<8x512xf32>, i32 -> vector<8x512xf32>
    %156 = vector.extract_strided_slice %0 {offsets = [5, 0], sizes = [1, 512], strides = [1, 1]} : vector<8x512xf32> to vector<1x512xf32>
    %157 = vector.broadcast %156 : vector<1x512xf32> to vector<8x512xf32>
    %158 = arith.mulf %155, %157 : vector<8x512xf32>
    %c496_i32_44 = arith.constant 496 : i32
    %159 = tpu.dynamic_rotate %134 by %c496_i32_44 dim 1 : vector<8x512xf32>, i32 -> vector<8x512xf32>
    %160 = vector.extract_strided_slice %0 {offsets = [6, 0], sizes = [1, 512], strides = [1, 1]} : vector<8x512xf32> to vector<1x512xf32>
    %161 = vector.broadcast %160 : vector<1x512xf32> to vector<8x512xf32>
    %162 = arith.mulf %159, %161 : vector<8x512xf32>
    %c495_i32_45 = arith.constant 495 : i32
    %163 = tpu.dynamic_rotate %134 by %c495_i32_45 dim 1 : vector<8x512xf32>, i32 -> vector<8x512xf32>
    %164 = vector.extract_strided_slice %0 {offsets = [7, 0], sizes = [1, 512], strides = [1, 1]} : vector<8x512xf32> to vector<1x512xf32>
    %165 = vector.broadcast %164 : vector<1x512xf32> to vector<8x512xf32>
    %166 = arith.mulf %163, %165 : vector<8x512xf32>
    %167 = tpu.concatenate %138, %142, %146, %150, %134, %154, %158, %162, %166 in 0 : vector<8x512xf32>, vector<8x512xf32>, vector<8x512xf32>, vector<8x512xf32>, vector<8x512xf32>, vector<8x512xf32>, vector<8x512xf32>, vector<8x512xf32>, vector<8x512xf32> -> vector<72x512xf32>
    %cst_46 = arith.constant dense<0.000000e+00> : vector<24x512xf32>
    %168 = tpu.matmul %1, %167, %cst_46 {dimension_numbers = #tpu.dot_dimension_numbers<[1], [0], [0], [1], [0, 0, 1, 1], [], []>} : vector<24x72xf32>, vector<72x512xf32>, vector<24x512xf32> -> vector<24x512xf32>
    %169 = vector.broadcast %2 : vector<24x1xf32> to vector<24x512xf32>
    %170 = arith.addf %168, %169 : vector<24x512xf32>
    %171 = arith.index_cast %c3_i32 : i32 to index
    %c0_47 = arith.constant 0 : index
    %c0_48 = arith.constant 0 : index
    %172 = vector.load %arg5[%171, %c0_47, %c0_48] : memref<4x24x512xf32, #tpu.memory_space<vmem>>, vector<1x24x512xf32>
    %173 = vector.shape_cast %172 : vector<1x24x512xf32> to vector<24x512xf32>
    %174 = vector.shape_cast %170 : vector<24x512xf32> to vector<1x24x512xf32>
    tpu.vector_store %arg5[%171, %c0_47, %c0_48], %174 {strides = array<i32>} : memref<4x24x512xf32, #tpu.memory_space<vmem>>, vector<1x24x512xf32>,
    %c4_i32 = arith.constant 4 : i32
    return
  }
  func.func @transform_0(%arg0: i32) -> (i32, i32, i32) {
    %c0_i32 = arith.constant 0 : i32
    %c0_i32_0 = arith.constant 0 : i32
    %c0_i32_1 = arith.constant 0 : i32
    return %arg0, %c0_i32, %c0_i32_0 : i32, i32, i32
  }
  func.func @transform_1(%arg0: i32) -> (i32, i32) {
    %c0_i32 = arith.constant 0 : i32
    %c0_i32_0 = arith.constant 0 : i32
    %c0_i32_1 = arith.constant 0 : i32
    return %c0_i32, %c0_i32_0 : i32, i32
  }
  func.func @transform_2(%arg0: i32) -> (i32, i32) {
    %c0_i32 = arith.constant 0 : i32
    %c0_i32_0 = arith.constant 0 : i32
    %c0_i32_1 = arith.constant 0 : i32
    return %c0_i32, %c0_i32_0 : i32, i32
  }
  func.func @transform_3(%arg0: i32) -> (i32, i32) {
    %c0_i32 = arith.constant 0 : i32
    %c0_i32_0 = arith.constant 0 : i32
    %c0_i32_1 = arith.constant 0 : i32
    return %c0_i32, %c0_i32_0 : i32, i32
  }
  func.func @transform_4(%arg0: i32) -> (i32, i32, i32) {
    %c0_i32 = arith.constant 0 : i32
    %c0_i32_0 = arith.constant 0 : i32
    %c0_i32_1 = arith.constant 0 : i32
    return %arg0, %c0_i32, %c0_i32_0 : i32, i32, i32
  }
}

</mosaic_0001>

<bundles_post_ra>
// kernel: tpu_custom_call.1
= control target key start
LH: loop header
LB: loop body
LE: loop exit
PB: predicated region body
PF: predicated region fallthrough
CT: control target
= control target key end

     0   :  { %9 = vsyncpa [#allocation3], 0  ;;  %s3625_s0 = inlined_call_operand.hbm [shape: f32[8,8,512], index: 0, kind: input, shape index: {}]   ;;  %s3626_s1 = inlined_call_operand.hbm [shape: f32[24,72], index: 1, kind: input, shape index: {}]   ;;  %s3627_s2 = inlined_call_operand.hbm [shape: f32[24,1], index: 2, kind: input, shape index: {}]   ;;  %s3628_s3 = inlined_call_operand.hbm [shape: f32[8,512], index: 3, kind: input, shape index: {}]   ;;  %s3629_s4 = inlined_call_operand.hbm [shape: f32[8,24,512], index: 4, kind: output, shape index: {}]  }
   0x1   :  { %11 = vsyncpa [#allocation3 + $0x1], 0 }
   0x2   :  { %12 = vsyncpa [#allocation6], 0 }
   0x3   :  { %13 = vsyncpa [#allocation9], 0 }
   0x4   :  { %14 = vsyncpa [#allocation4], 0 }
   0x5   :  { %16 = vsyncpa [#allocation4 + $0x1], 0  ;;  %s2352_s15 = smov 0   ;;  %s2354_s16 = smov 0  }
   0x6   :  { %s2356_s17 = smov 0   ;;  %s2358_s18 = smov 0  }
   0x7 LB: > { %s2373_s19 = sadd.s32 4294967295, %s2304_s18   ;;  %s1797_s20 = sadd.s32 4294967294, %s2304_s18   ;;  %s2304_s18 = sphi %s2358_s18, %s3661_s18   ;;  %s2300_s17 = sphi %s2356_s17, %s3660_s17   ;;  %s2296_s16 = sphi %s2354_s16, %s3659_s16   ;;  %s2292_s15 = sphi %s2352_s15, %s3658_s15  }
   0x8   : > { %p42_p0 = scmp.ne.s32.totalorder %s2296_s16, %s2292_s15  ;;  %p3630_p1 = scmp.eq.s32.totalorder %s2373_s19, 0 }
   0x9   : > { %p135_p3 = scmp.eq.s32.totalorder %s1797_s20, 1  ;;  %p1798_p5 = scmp.ge.s32.totalorder %s2304_s18, 1 }
   0xa   : > { %p2382_p4 = por %p3630_p1, %p42_p0  ;;  %p142_p7 = scmp.lt.s32.totalorder %s2304_s18, 3 }
   0xb   : > { %p2387_p6 = por %p135_p3, %p42_p0  ;;  %s2306_s24 = smov [#allocation5]  }
   0xc   : > { %s3637_s21 = scalar_select %p2382_p4, 1, 0 }
   0xd   : > { %s3638_s22 = scalar_select %p2387_p6, 1, 0 }
   0xe   : > { %p2392_p8 = pnand %p1798_p5, %p142_p7  ;;  %s154_s25 = sshll.u32 %s2306_s24, 4  ;;  %s2396_s25 = int_to_ptr.vmem [resolvable:$true] %s154_s25 }
   0xf   : > { %s2307_s27 = smov [#allocation7]   ;;  %s2308_s29 = smov [#allocation8]  }
  0x10   : > { %s3639_s23 = scalar_select %p2392_p8, 1, 0 }
  0x11   : > { %p2037_p9 = pneg %p2392_p8  ;;  %s167_s28 = sshll.u32 %s2307_s27, 4  ;;  %s2407_s28 = int_to_ptr.vmem [resolvable:$true] %s167_s28 }
  0x12   : > { %s2409_s30 = sshll.u32 %s2308_s29, 4  ;;  %s2116_s7 = scalar_lea.hbm %s3626_s1, 384  ;;  %s182_s30 = int_to_ptr.vmem [resolvable:$true] %s2409_s30 }
  0x13   : > { %p2403_p11 = pnand %p2037_p9, %p3630_p1  ;;  %p2117_p12 = scmp.ne.s32.totalorder %s3626_s1, %s2116_s7 }
  0x14   : > { %p2123_p5 = scmp.lt.u32.totalorder %s2116_s7, %s3626_s1 }
  0x15   : > { %p2419_p13 = pneg %p2403_p11 }
  0x17   : > { %p2119_p0 = pnand %p2419_p13, %p2117_p12 }
  0x19   : > { %p2120_p3 = pneg %p2119_p0 }
  0x1b   : > { %p2125_p7 = pnand %p2123_p5, %p2120_p3 }
  0x1d   : > { %2128 = shalt.err (!%p2125_p7)
}
  0x1e   : > { %s2129_s13 = scalar_lea.vmem %s2396_s25, 384  ;;  %p2137_p2 = scmp.lt.s32.totalorder %s2396_s25, %s2396_s25 }
  0x1f   : > { %p2130_p9 = scmp.ne.s32.totalorder %s2396_s25, %s2129_s13  ;;  %p2138_p6 = scmp.lt.s32.totalorder %s2129_s13, %s2129_s13 }
  0x21   : > { %p2132_p10 = pnand %p2130_p9, %p2419_p13  ;;  %p2139_p12 = por %p2138_p6, %p2137_p2 }
  0x23   : > { %p2133_p1 = pneg %p2132_p10 }
  0x25   : > { %p2140_p0 = pnand %p2139_p12, %p2133_p1 }
  0x27   : > { %2143 = shalt.err (!%p2140_p0)
}
  0x28   : > { %s2309_s14 = smov 128   ;;  %s2310_s20 = smov 8  }
  0x29   : > { %2040 = dma.hbm_to_vmem [thread:$0]  (!%p2403_p11), %s3626_s1, 384, %s2396_s25, [#allocation6], %s2309_s14, %s2309_s14, %s2310_s20  }
  0x2a   : > { %s2144_s6 = scalar_lea.hbm %s3627_s2, 384 }
  0x2b   : > { %p2145_p2 = scmp.ne.s32.totalorder %s3627_s2, %s2144_s6  ;;  %p2151_p10 = scmp.lt.u32.totalorder %s2144_s6, %s3627_s2 }
  0x2d   : > { %p2147_p1 = pnand %p2145_p2, %p2419_p13 }
  0x2f   : > { %p2148_p6 = pneg %p2147_p1 }
  0x31   : > { %p2153_p3 = pnand %p2151_p10, %p2148_p6 }
  0x33   : > { %2156 = shalt.err (!%p2153_p3)
}
  0x34   : > { %s2157_s25 = scalar_lea.vmem %s2407_s28, 384  ;;  %p2165_p12 = scmp.lt.s32.totalorder %s2407_s28, %s2407_s28 }
  0x35   : > { %p2158_p5 = scmp.ne.s32.totalorder %s2407_s28, %s2157_s25  ;;  %p2166_p0 = scmp.lt.s32.totalorder %s2157_s25, %s2157_s25 }
  0x37   : > { %p2160_p7 = pnand %p2158_p5, %p2419_p13  ;;  %p2167_p2 = por %p2166_p0, %p2165_p12 }
  0x39   : > { %p2161_p9 = pneg %p2160_p7 }
  0x3b   : > { %p2168_p1 = pnand %p2167_p2, %p2161_p9 }
  0x3d   : > { %2171 = shalt.err (!%p2168_p1)
}
  0x3e   : > { %2043 = dma.hbm_to_vmem [thread:$0]  (!%p2403_p11), %s3627_s2, 384, %s2407_s28, [#allocation6], %s2309_s14, %s2309_s14, %s2310_s20  }
  0x3f   : > { %s2172_s29 = scalar_lea.hbm %s3628_s3, 512 }
  0x40   : > { %p2173_p6 = scmp.ne.s32.totalorder %s3628_s3, %s2172_s29  ;;  %p2179_p5 = scmp.lt.u32.totalorder %s2172_s29, %s3628_s3 }
  0x42   : > { %p2175_p10 = pnand %p2173_p6, %p2419_p13 }
  0x44   : > { %p2176_p3 = pneg %p2175_p10 }
  0x46   : > { %p2181_p7 = pnand %p2179_p5, %p2176_p3 }
  0x48   : > { %2184 = shalt.err (!%p2181_p7)
}
  0x49   : > { %s2185_s9 = scalar_lea.vmem %s182_s30, 512  ;;  %p2193_p2 = scmp.lt.s32.totalorder %s182_s30, %s182_s30 }
  0x4a   : > { %p2186_p9 = scmp.ne.s32.totalorder %s182_s30, %s2185_s9  ;;  %p2194_p1 = scmp.lt.s32.totalorder %s2185_s9, %s2185_s9 }
  0x4c   : > { %p2188_p12 = pnand %p2186_p9, %p2419_p13  ;;  %p2195_p4 = por %p2194_p1, %p2193_p2 }
  0x4e   : > { %p2189_p0 = pneg %p2188_p12 }
  0x50   : > { %p2196_p8 = pnand %p2195_p4, %p2189_p0 }
  0x52   : > { %2199 = shalt.err (!%p2196_p8)
}
  0x53   : > { %2046 = dma.hbm_to_vmem [thread:$0]  (!%p2403_p11), %s3628_s3, 512, %s182_s30, [#allocation9]  }
  0x54   : > { %s2483_s10 = sadd.s32 1, %s2304_s18   ;;  %s29_s26 = sadd.s32 1, %s2300_s17 }
  0x55   : > { %s26_s20 = ssub.s32 %s2304_s18, %s2483_s10  ;;  %p36_p8 = scmp.ne.s32.totalorder %s2300_s17, %s2296_s16 }
  0x56   : > { %p27_p4 = scmp.eq.s32.totalorder %s26_s20, 0  ;;  %p37_p13 = scmp.eq.s32.totalorder %s2304_s18, 0 }
  0x57   : > { %p2058_p6 = scmp.lt.s32.totalorder %s2304_s18, 2  ;;  %p3642_p3 = scmp.eq.s32.totalorder %s2373_s19, 1 }
  0x58   : > { %s2493_s11 = scalar_select %p27_p4, %s2300_s17, %s29_s26  }
  0x59   : > { %p38_p10 = por %p37_p13, %p36_p8  ;;  %p2497_p5 = por %p3642_p3, %p36_p8 }
  0x5a   : > { %s192_s12 = sand.u32 1, %s2300_s17   ;;  %s1890_s13 = sshll.u32 %s2304_s18, 11 }
  0x5b   : > { %s1803_s30 = sshll.u32 %s192_s12, 7  ;;  %s2506_s29 = scalar_lea.hbm %s3625_s0, %s1890_s13 }
  0x5c   : > { %s196_s5 = scalar_lea.vmem [#allocation2], %s1803_s30  ;;  %p2508_p11 = pnand %p2058_p6, %p38_p10 }
  0x5d   : > { %s204_s6 = sshll.u32 %s196_s5, 4  ;;  %s2514_s8 = scalar_lea.sflag [#allocation3], %s192_s12  ;;  %s2512_s6 = int_to_ptr.vmem [resolvable:$true] %s204_s6 }
  0x5e   : > { %s2200_s9 = scalar_lea.hbm %s2506_s29, 2048  ;;  %p2202_p9 = pneg %p2508_p11 }
  0x5f   : > { %p2201_p7 = scmp.ne.s32.totalorder %s2506_s29, %s2200_s9  ;;  %s2205_s20 = scalar_lea.hbm %s3625_s0, 4096 }
  0x60   : > { %p2206_p2 = scmp.lt.u32.totalorder %s2506_s29, %s3625_s0  ;;  %p2207_p1 = scmp.lt.u32.totalorder %s2205_s20, %s2200_s9 }
  0x61   : > { %p2203_p12 = pnand %p2202_p9, %p2201_p7  ;;  %p2209_p8 = scmp.lt.u32.totalorder %s2200_s9, %s2506_s29 }
  0x62   : > { %p2208_p4 = por %p2207_p1, %p2206_p2 }
  0x63   : > { %p2204_p0 = pneg %p2203_p12 }
  0x64   : > { %p2210_p13 = por %p2209_p8, %p2208_p4 }
  0x66   : > { %p2211_p6 = pnand %p2210_p13, %p2204_p0 }
  0x68   : > { %2214 = shalt.err (!%p2211_p6)
}
  0x69   : > { %s2215_s12 = scalar_lea.vmem %s2512_s6, 2048  ;;  %s2311_s30 = smov [#allocation2]  }
  0x6a   : > { %p2216_p10 = scmp.ne.s32.totalorder %s2512_s6, %s2215_s12  ;;  %s2220_s24 = sshll.u32 %s2311_s30, 4  ;;  %s2221_s24 = int_to_ptr.vmem [resolvable:$false] %s2220_s24 }
  0x6b   : > { %s2222_s27 = scalar_lea.vmem %s2221_s24, 4096  ;;  %p2223_p12 = scmp.lt.s32.totalorder %s2512_s6, %s2221_s24 }
  0x6c   : > { %p2218_p3 = pnand %p2216_p10, %p2202_p9  ;;  %p2224_p2 = scmp.lt.s32.totalorder %s2222_s27, %s2215_s12 }
  0x6e   : > { %p2219_p7 = pneg %p2218_p3  ;;  %p2225_p1 = por %p2224_p2, %p2223_p12 }
  0x70   : > { %p2226_p4 = pnand %p2225_p1, %p2219_p7 }
  0x72   : > { %2229 = shalt.err (!%p2226_p4)
}
  0x73   : > { %s2312_s5 = smov 512   ;;  %s2313_s9 = smov 32  }
  0x74   : > { %2050 = dma.hbm_to_vmem [thread:$0]  (!%p2508_p11), %s2506_s29, 2048, %s2512_s6, %s2514_s8, %s2312_s5, %s2312_s5, %s2313_s9  }
  0x75   : > { %p3645_p9 = scmp.ne.s32.totalorder %s3639_s23, 0 }
  0x77   : > { %216 = sbr.rel (%p3645_p9) target bundleno = 748 (0x2ec), region = 36 }
  0x7e   : > { %s2545_s28 = sand.u32 1, %s2296_s16   ;;  %p3646_p0 = scmp.ne.s32.totalorder %s3637_s21, 0 }
  0x7f   : > { %s1808_s14 = sshll.u32 %s2545_s28, 7  ;;  %s219_s20 = scalar_lea.sflag [#allocation3], %s2545_s28 }
  0x80   : > { %s2549_s26 = scalar_lea.vmem [#allocation2], %s1808_s14 }
  0x81   : > { %2275 = dma.done.wait (%p3646_p0), %s219_s20, 2048  }
  0x82   : > { %2277 = vsyncadd (%p3646_p0), %s219_s20, 4294965248  ;;  %p3647_p11 = scmp.eq.s32.totalorder %s2373_s19, 0 }
  0x84   : > { %2279 = dma.done.wait (%p3647_p11), [#allocation6], 768   ;;  %p3648_p8 = pmov %p3647_p11 }
  0x86   : > { %2281 = vsyncadd (%p3648_p8), [#allocation6], 4294966528  ;;  %p3649_p13 = pmov %p3648_p8 }
  0x87   : > { %p3650_p6 = pmov %p3648_p8 }
  0x88   : > { %2283 = dma.done.wait (%p3649_p13), [#allocation9], 512  }
  0x89   : > { %2285 = vsyncadd (%p3650_p6), [#allocation9], 4294966784  ;;  %v2564_v0 = vld [vmem:[%s2549_s26 + $0x10] sm:$0xff]  ;;  %v2567_v1 = vld [vmem:[%s2549_s26] sm:$0xff]  ;;  %s2314_s21 = smov 17   ;;  %s2315_s23 = smov 16   ;;  %v283_v9 = vlaneseq }
  0x8a   : > { %279 = vrot.lane.b32.xlu1 %v2564_v0, %s2314_s21  ;;  %275 = vrot.lane.b32.xlu0 %v2567_v1, %s2314_s21  ;;  %v2574_v2 = vld [vmem:[%s2549_s26 + $0x18] sm:$0xff]  ;;  %v2577_v3 = vld [vmem:[%s2549_s26 + $0x8] sm:$0xff]  ;;  %s2316_s29 = smov 15   ;;  %s2317_s6 = smov 1   ;;  %v3633_v8 = vmov 0.0   ;;  %v2718_v19 = vld [vmem:[#allocation8] sm:$0xff] }
  0x8b   : > { %s2318_s7 = smov 127   ;;  %s2319_s8 = smov 113   ;;  %v2640_v4 = vld [vmem:[%s2549_s26 + $0x28] sm:$0xff]  ;;  %v2643_v5 = vld [vmem:[%s2549_s26 + $0x20] sm:$0xff]  ;;  %v2650_v6 = vld [vmem:[%s2549_s26 + $0x38] sm:$0xff]  ;;  %630 = vmatprep.mubr.f32.mxu0 %v3633_v8  ;;  %713 = vmatprep.mubr.f32.mxu1 %v3633_v8  ;;  %v2705_v10 = vshrl.u32 %v283_v9, 7 }
  0x8c   : > { %s2320_s13 = smov 112   ;;  %s2321_s12 = smov 111   ;;  %v2653_v7 = vld [vmem:[%s2549_s26 + $0x30] sm:$0xff]  ;;  %v2707_v13 = vand.u32 127, %v283_v9  ;;  %v2715_v16 = vld [vmem:[#allocation8 + $0x8] sm:$0xff]  ;;  %v2720_v20 = vld [vmem:[#allocation8 + $0x18] sm:$0xff] }
  0x8d   : > { %v292_v14 = vsub.s32 0, %v2705_v10  ;;  %v325_v15 = vsub.s32 1, %v2705_v10  ;;  %v2722_v21 = vld [vmem:[#allocation8 + $0x10] sm:$0xff]  ;;  %v2770_v39 = vld [vmem:[%s2549_s26 + $0x48] sm:$0xff]  ;;  %v2792_v53 = vld [vmem:[%s2549_s26 + $0x58] sm:$0xff]  ;;  %v358_v60 = vsub.s32 2, %v2705_v10 }
  0x8e   : > { %281 = vrot.lane.b32.xlu1 %v2574_v2, %s2314_s21  ;;  %277 = vrot.lane.b32.xlu0 %v2577_v3, %s2314_s21  ;;  %vm285_vm0 = vcmp.lt.s32.totalorder %v2707_v13, 17  ;;  %vm318_vm1 = vcmp.lt.s32.totalorder %v2707_v13, 16  ;;  %v2773_v40 = vld [vmem:[%s2549_s26 + $0x40] sm:$0xff]  ;;  %v2795_v54 = vld [vmem:[%s2549_s26 + $0x50] sm:$0xff]  ;;  %v391_v61 = vsub.s32 3, %v2705_v10  ;;  %vm351_vm2 = vcmp.lt.s32.totalorder %v2707_v13, 15 }
  0x8f   : > { %v2730_v22 = vrot.slane %v2715_v16, %v292_v14  ;;  %v2733_v23 = vrot.slane %v2715_v16, %v325_v15  ;;  %v2738_v25 = vrot.slane %v2718_v19, %v292_v14  ;;  %v2741_v28 = vrot.slane %v2718_v19, %v325_v15  ;;  %3651 = vst [vmem:[#allocation15_spill] sm:$0xff] %v2773_v40  ;;  %s2019_s30 = smul.u32 384, %s2545_s28  ;;  %s1681_s20 = scalar_lea.sflag [#allocation4], %s2545_s28 }
  0x90   : > { %v2744_v29 = vrot.slane %v2720_v20, %v292_v14  ;;  %v2747_v30 = vrot.slane %v2720_v20, %v325_v15  ;;  %v2750_v31 = vrot.slane %v2722_v21, %v292_v14  ;;  %v2759_v35 = vrot.slane %v2722_v21, %v325_v15  ;;  %s2020_s27 = smul.u32 6144, %s2373_s19 }
  0x91   : > { %v2805_v9 = vrot.slane %v2715_v16, %v358_v60  ;;  %vm384_vm3 = vcmp.lt.s32.totalorder %v2707_v13, 1  ;;  %v2818_v14 = vrot.slane %v2718_v19, %v358_v60  ;;  %v2821_v15 = vrot.slane %v2722_v21, %v358_v60  ;;  %s3478_s24 = scalar_lea.vmem [#allocation10], %s2019_s30 }
  0x92   : > { %312 = vrot.lane.b32.xlu1 %v2577_v3, %s2315_s23  ;;  %310 = vrot.lane.b32.xlu0 %v2567_v1, %s2315_s23  ;;  %vm417_vm4 = vcmp.lt.s32.totalorder %v2707_v13, 127  ;;  %vm450_vm5 = vcmp.lt.s32.totalorder %v2707_v13, 113  ;;  %vm483_vm6 = vcmp.lt.s32.totalorder %v2707_v13, 112  ;;  %vm516_vm7 = vcmp.lt.s32.totalorder %v2707_v13, 111  ;;  %s1695_s5 = sshll.u32 %s3478_s24, 4  ;;  %s3573_s14 = scalar_lea.hbm %s3629_s4, %s2020_s27  ;;  %s3575_s5 = int_to_ptr.vmem [resolvable:$true] %s1695_s5 }
  0x93   : > { %vm556_vm8 = vcmask 588800  }
  0x96   : > { %316 = vrot.lane.b32.xlu1 %v2574_v2, %s2315_s23  ;;  %314 = vrot.lane.b32.xlu0 %v2564_v0, %s2315_s23 }
  0x9a   : > { %345 = vrot.lane.b32.xlu1 %v2577_v3, %s2316_s29  ;;  %343 = vrot.lane.b32.xlu0 %v2567_v1, %s2316_s29 }
  0x9e   : > { %349 = vrot.lane.b32.xlu1 %v2574_v2, %s2316_s29  ;;  %347 = vrot.lane.b32.xlu0 %v2564_v0, %s2316_s29 }
  0xa2   : > { %378 = vrot.lane.b32.xlu1 %v2577_v3, %s2317_s6  ;;  %376 = vrot.lane.b32.xlu0 %v2567_v1, %s2317_s6 }
  0xa6   : > { %382 = vrot.lane.b32.xlu1 %v2574_v2, %s2317_s6  ;;  %380 = vrot.lane.b32.xlu0 %v2564_v0, %s2317_s6 }
  0xaa   : > { %411 = vrot.lane.b32.xlu1 %v2577_v3, %s2318_s7  ;;  %409 = vrot.lane.b32.xlu0 %v2567_v1, %s2318_s7 }
  0xae   : > { %415 = vrot.lane.b32.xlu1 %v2574_v2, %s2318_s7  ;;  %413 = vrot.lane.b32.xlu0 %v2564_v0, %s2318_s7 }
  0xb2   : > { %444 = vrot.lane.b32.xlu1 %v2577_v3, %s2319_s8  ;;  %442 = vrot.lane.b32.xlu0 %v2567_v1, %s2319_s8 }
  0xb6   : > { %448 = vrot.lane.b32.xlu1 %v2574_v2, %s2319_s8  ;;  %446 = vrot.lane.b32.xlu0 %v2564_v0, %s2319_s8 }
  0xba   : > { %477 = vrot.lane.b32.xlu1 %v2577_v3, %s2320_s13  ;;  %475 = vrot.lane.b32.xlu0 %v2567_v1, %s2320_s13 }
  0xbe   : > { %481 = vrot.lane.b32.xlu1 %v2574_v2, %s2320_s13  ;;  %479 = vrot.lane.b32.xlu0 %v2564_v0, %s2320_s13 }
  0xc2   : > { %510 = vrot.lane.b32.xlu1 %v2577_v3, %s2321_s12  ;;  %508 = vrot.lane.b32.xlu0 %v2567_v1, %s2321_s12 }
  0xc6   : > { %514 = vrot.lane.b32.xlu1 %v2574_v2, %s2321_s12  ;;  %512 = vrot.lane.b32.xlu0 %v2564_v0, %s2321_s12 }
  0xca   : > { %751 = vrot.lane.b32.xlu1 %v2640_v4, %s2314_s21  ;;  %749 = vrot.lane.b32.xlu0 %v2643_v5, %s2314_s21 }
  0xce   : > { %755 = vrot.lane.b32.xlu1 %v2650_v6, %s2314_s21  ;;  %753 = vrot.lane.b32.xlu0 %v2653_v7, %s2314_s21 }
  0xd2   : > { %767 = vrot.lane.b32.xlu1 %v2640_v4, %s2315_s23  ;;  %765 = vrot.lane.b32.xlu0 %v2643_v5, %s2315_s23 }
  0xd6   : > { %771 = vrot.lane.b32.xlu1 %v2650_v6, %s2315_s23  ;;  %769 = vrot.lane.b32.xlu0 %v2653_v7, %s2315_s23 }
  0xda   : > { %783 = vrot.lane.b32.xlu1 %v2640_v4, %s2316_s29  ;;  %781 = vrot.lane.b32.xlu0 %v2643_v5, %s2316_s29 }
  0xde   : > { %787 = vrot.lane.b32.xlu1 %v2650_v6, %s2316_s29  ;;  %785 = vrot.lane.b32.xlu0 %v2653_v7, %s2316_s29 }
  0xe2   : > { %799 = vrot.lane.b32.xlu1 %v2640_v4, %s2317_s6  ;;  %797 = vrot.lane.b32.xlu0 %v2643_v5, %s2317_s6 }
  0xe6   : > { %803 = vrot.lane.b32.xlu1 %v2650_v6, %s2317_s6  ;;  %801 = vrot.lane.b32.xlu0 %v2653_v7, %s2317_s6 }
  0xea   : > { %815 = vrot.lane.b32.xlu1 %v2640_v4, %s2318_s7  ;;  %813 = vrot.lane.b32.xlu0 %v2643_v5, %s2318_s7 }
  0xee   : > { %819 = vrot.lane.b32.xlu1 %v2650_v6, %s2318_s7  ;;  %817 = vrot.lane.b32.xlu0 %v2653_v7, %s2318_s7 }
  0xf2   : > { %831 = vrot.lane.b32.xlu1 %v2640_v4, %s2319_s8  ;;  %829 = vrot.lane.b32.xlu0 %v2643_v5, %s2319_s8 }
  0xf6   : > { %835 = vrot.lane.b32.xlu1 %v2650_v6, %s2319_s8  ;;  %833 = vrot.lane.b32.xlu0 %v2653_v7, %s2319_s8 }
  0xfa   : > { %847 = vrot.lane.b32.xlu1 %v2640_v4, %s2320_s13  ;;  %845 = vrot.lane.b32.xlu0 %v2643_v5, %s2320_s13 }
  0xfc   : > { %v280_v11 = vpop.permute.xlu1 %279  ;;  %v276_v12 = vpop.permute.xlu0 %275 }
  0xfe   : > { %851 = vrot.lane.b32.xlu1 %v2650_v6, %s2320_s13  ;;  %849 = vrot.lane.b32.xlu0 %v2653_v7, %s2320_s13 }
 0x100   : > { %v282_v17 = vpop.permute.xlu1 %281  ;;  %v278_v18 = vpop.permute.xlu0 %277 }
 0x101   : > { %v288_v24 = vsel %vm285_vm0, %v276_v12, %v278_v18  ;;  %v289_v32 = vsel %vm285_vm0, %v282_v17, %v276_v12  ;;  %v286_v34 = vsel %vm285_vm0, %v280_v11, %v282_v17  ;;  %v287_v36 = vsel %vm285_vm0, %v278_v18, %v280_v11 }
 0x102   : > { %863 = vrot.lane.b32.xlu1 %v2640_v4, %s2321_s12  ;;  %861 = vrot.lane.b32.xlu0 %v2643_v5, %s2321_s12  ;;  %v307_v37 = vmul.f32 %v2730_v22, %v288_v24  ;;  %v306_v44 = vmul.f32 %v2738_v25, %v289_v32  ;;  %v309_v45 = vmul.f32 %v2744_v29, %v286_v34 }
 0x103   : > { %v308_v49 = vmul.f32 %v2750_v31, %v287_v36  ;;  %v2813_v11 = vrot.slane %v2715_v16, %v391_v61  ;;  %v2824_v17 = vrot.slane %v2720_v20, %v358_v60  ;;  %v2839_v36 = vrot.slane %v2720_v20, %v391_v61 }
 0x104   : > { %v313_v26 = vpop.permute.xlu1 %312  ;;  %v311_v27 = vpop.permute.xlu0 %310 }
 0x105   : > { %v321_v33 = vsel %vm318_vm1, %v311_v27, %v313_v26 }
 0x106   : > { %867 = vrot.lane.b32.xlu1 %v2650_v6, %s2321_s12  ;;  %865 = vrot.lane.b32.xlu0 %v2653_v7, %s2321_s12  ;;  %v340_v38 = vmul.f32 %v2733_v23, %v321_v33 }
 0x108   : > { %v317_v41 = vpop.permute.xlu1 %316  ;;  %v315_v42 = vpop.permute.xlu0 %314  ;;  %v1891_v43 = vpack.c.bf16 %v340_v38, %v307_v37 }
 0x109   : > { %v322_v46 = vsel %vm318_vm1, %v317_v41, %v311_v27  ;;  %v320_v47 = vsel %vm318_vm1, %v313_v26, %v315_v42  ;;  %v319_v48 = vsel %vm318_vm1, %v315_v42, %v317_v41  ;;  %v2827_v26 = vrot.slane %v2718_v19, %v391_v61 }
 0x10a   : > { %1063 = vrot.lane.b32.xlu1 %v2770_v39, %s2314_s21  ;;  %1061 = vrot.lane.b32.xlu0 %v2773_v40, %s2314_s21  ;;  %v339_v50 = vmul.f32 %v2741_v28, %v322_v46  ;;  %v342_v51 = vmul.f32 %v2747_v30, %v319_v48  ;;  %v341_v52 = vmul.f32 %v2759_v35, %v320_v47  ;;  %v424_v47 = vsub.s32 4, %v2705_v10 }
 0x10b   : > { %1892 = vmatprep.subr.bf16.mxu0 %v1891_v43  ;;  %v2830_v27 = vrot.slane %v2722_v21, %v391_v61 }
 0x10c   : > { %v346_v55 = vpop.permute.xlu1 %345  ;;  %v344_v56 = vpop.permute.xlu0 %343  ;;  %v1893_v57 = vpack.c.bf16 %v339_v50, %v306_v44  ;;  %v1907_v58 = vpack.c.bf16 %v342_v51, %v309_v45  ;;  %v1909_v59 = vpack.c.bf16 %v341_v52, %v308_v49 }
 0x10d   : > { %v354_v12 = vsel %vm351_vm2, %v344_v56, %v346_v55 }
 0x10e   : > { %1067 = vrot.lane.b32.xlu1 %v2792_v53, %s2314_s21  ;;  %1065 = vrot.lane.b32.xlu0 %v2795_v54, %s2314_s21  ;;  %v373_v37 = vmul.f32 %v2805_v9, %v354_v12 }
 0x10f   : > { %1894 = vmatpush1.bf16.msra.mxu0 %v1893_v57  ;;  %1908 = vmatprep.subr.bf16.mxu1 %v1907_v58 }
 0x110   : > { %1910 = vmatpush1.bf16.msra.mxu1 %v1909_v59  ;;  %v350_v62 = vpop.permute.xlu1 %349  ;;  %v348_v63 = vpop.permute.xlu0 %347 }
 0x111   : > { %v355_v32 = vsel %vm351_vm2, %v350_v62, %v344_v56  ;;  %v353_v33 = vsel %vm351_vm2, %v346_v55, %v348_v63  ;;  %v352_v38 = vsel %vm351_vm2, %v348_v63, %v350_v62  ;;  %v2868_v62 = vrot.slane %v2718_v19, %v424_v47 }
 0x112   : > { %1079 = vrot.lane.b32.xlu1 %v2770_v39, %s2315_s23  ;;  %1077 = vrot.lane.b32.xlu0 %v2773_v40, %s2315_s23  ;;  %v372_v42 = vmul.f32 %v2818_v14, %v355_v32  ;;  %v374_v43 = vmul.f32 %v2821_v15, %v353_v33  ;;  %v375_v48 = vmul.f32 %v2824_v17, %v352_v38 }
 0x113   : > { %v2871_v63 = vrot.slane %v2720_v20, %v424_v47 }
 0x114   : > { %v379_v18 = vpop.permute.xlu1 %378  ;;  %v377_v24 = vpop.permute.xlu0 %376 }
 0x115   : > { %v387_v34 = vsel %vm384_vm3, %v377_v24, %v379_v18 }
 0x116   : > { %v406_v41 = vmul.f32 %v2813_v11, %v387_v34  ;;  %1083 = vrot.lane.b32.xlu1 %v2792_v53, %s2315_s23  ;;  %1081 = vrot.lane.b32.xlu0 %v2795_v54, %s2315_s23 }
 0x118   : > { %v383_v44 = vpop.permute.xlu1 %382  ;;  %v381_v45 = vpop.permute.xlu0 %380  ;;  %v1895_v46 = vpack.c.bf16 %v406_v41, %v373_v37 }
 0x119   : > { %v388_v49 = vsel %vm384_vm3, %v383_v44, %v377_v24  ;;  %v385_v50 = vsel %vm384_vm3, %v381_v45, %v383_v44  ;;  %v386_v51 = vsel %vm384_vm3, %v379_v18, %v381_v45  ;;  %v2880_v18 = vrot.slane %v2715_v16, %v424_v47 }
 0x11a   : > { %v405_v52 = vmul.f32 %v2827_v26, %v388_v49  ;;  %v407_v55 = vmul.f32 %v2830_v27, %v386_v51  ;;  %v408_v56 = vmul.f32 %v2839_v36, %v385_v50  ;;  %1095 = vrot.lane.b32.xlu1 %v2770_v39, %s2316_s29  ;;  %1093 = vrot.lane.b32.xlu0 %v2773_v40, %s2316_s29 }
 0x11b   : > { %1896 = vmatprep.subr.bf16.mxu0 %v1895_v46  ;;  %v2883_v24 = vrot.slane %v2722_v21, %v424_v47 }
 0x11c   : > { %v412_v57 = vpop.permute.xlu1 %411  ;;  %v410_v58 = vpop.permute.xlu0 %409  ;;  %v1897_v59 = vpack.c.bf16 %v405_v52, %v372_v42  ;;  %v1911_v60 = vpack.c.bf16 %v408_v56, %v375_v48  ;;  %v1913_v61 = vpack.c.bf16 %v407_v55, %v374_v43 }
 0x11d   : > { %v420_v12 = vsel %vm417_vm4, %v410_v58, %v412_v57 }
 0x11e   : > { %1099 = vrot.lane.b32.xlu1 %v2792_v53, %s2316_s29  ;;  %1097 = vrot.lane.b32.xlu0 %v2795_v54, %s2316_s29  ;;  %v438_v34 = vmul.f32 %v2868_v62, %v420_v12 }
 0x11f   : > { %1898 = vmatpush1.bf16.msra.mxu0 %v1897_v59  ;;  %1912 = vmatprep.subr.bf16.mxu1 %v1911_v60 }
 0x120   : > { %1914 = vmatpush1.bf16.msra.mxu1 %v1913_v61  ;;  %v416_v32 = vpop.permute.xlu1 %415  ;;  %v414_v33 = vpop.permute.xlu0 %413  ;;  %v1901_v50 = vpack.c.bf16 %v438_v34, %v2567_v1 }
 0x121   : > { %v421_v37 = vsel %vm417_vm4, %v416_v32, %v410_v58  ;;  %v418_v38 = vsel %vm417_vm4, %v414_v33, %v416_v32  ;;  %v419_v41 = vsel %vm417_vm4, %v412_v57, %v414_v33 }
 0x122   : > { %v441_v42 = vmul.f32 %v2871_v63, %v421_v37  ;;  %v439_v43 = vmul.f32 %v2880_v18, %v419_v41  ;;  %v440_v44 = vmul.f32 %v2883_v24, %v418_v38  ;;  %1111 = vrot.lane.b32.xlu1 %v2770_v39, %s2317_s6  ;;  %1109 = vrot.lane.b32.xlu0 %v2773_v40, %s2317_s6 }
 0x124   : > { %v445_v45 = vpop.permute.xlu1 %444  ;;  %v443_v46 = vpop.permute.xlu0 %442  ;;  %v1899_v47 = vpack.c.bf16 %v439_v43, %v2577_v3  ;;  %v1915_v48 = vpack.c.bf16 %v441_v42, %v2574_v2  ;;  %v1917_v49 = vpack.c.bf16 %v440_v44, %v2564_v0  ;;  %v490_v3 = vsub.s32 6, %v2705_v10 }
 0x125   : > { %v457_v2 = vsub.s32 5, %v2705_v10  ;;  %v453_v38 = vsel %vm450_vm5, %v443_v46, %v445_v45 }
 0x126   : > { %1115 = vrot.lane.b32.xlu1 %v2792_v53, %s2317_s6  ;;  %1113 = vrot.lane.b32.xlu0 %v2795_v54, %s2317_s6  ;;  %v2925_v58 = vrot.slane %v2718_v19, %v490_v3  ;;  %v2934_v12 = vrot.slane %v2720_v20, %v490_v3  ;;  %v2943_v33 = vrot.slane %v2715_v16, %v490_v3 }
 0x127   : > { %1900 = vmatprep.subr.bf16.mxu0 %v1899_v47  ;;  %1916 = vmatprep.subr.bf16.mxu1 %v1915_v48  ;;  %v2916_v0 = vrot.slane %v2720_v20, %v457_v2  ;;  %v2919_v1 = vrot.slane %v2715_v16, %v457_v2  ;;  %v2922_v55 = vrot.slane %v2722_v21, %v457_v2 }
 0x128   : > { %1902 = vmatpush1.bf16.msra.mxu0 %v1901_v50  ;;  %1918 = vmatpush1.bf16.msra.mxu1 %v1917_v49  ;;  %v449_v51 = vpop.permute.xlu1 %448  ;;  %v447_v52 = vpop.permute.xlu0 %446  ;;  %v2946_v34 = vrot.slane %v2722_v21, %v490_v3  ;;  %v2949_v37 = vrot.slane %v2718_v19, %v457_v2  ;;  %v523_v3 = vsub.s32 7, %v2705_v10 }
 0x129   : > { %v454_v59 = vsel %vm450_vm5, %v449_v51, %v443_v46  ;;  %v451_v60 = vsel %vm450_vm5, %v447_v52, %v449_v51  ;;  %v452_v61 = vsel %vm450_vm5, %v445_v45, %v447_v52 }
 0x12a   : > { %1127 = vrot.lane.b32.xlu1 %v2770_v39, %s2318_s7  ;;  %1125 = vrot.lane.b32.xlu0 %v2773_v40, %s2318_s7  ;;  %v474_v41 = vmul.f32 %v2916_v0, %v454_v59  ;;  %v472_v42 = vmul.f32 %v2919_v1, %v452_v61  ;;  %v473_v43 = vmul.f32 %v2922_v55, %v451_v60 }
 0x12b   : > { %v471_v2 = vmul.f32 %v2949_v37, %v453_v38  ;;  %v2981_v10 = vrot.slane %v2720_v20, %v523_v3  ;;  %v2984_v38 = vrot.slane %v2722_v21, %v523_v3 }
 0x12c   : > { %v478_v56 = vpop.permute.xlu1 %477  ;;  %v476_v57 = vpop.permute.xlu0 %475 }
 0x12d   : > { %v486_v32 = vsel %vm483_vm6, %v476_v57, %v478_v56 }
 0x12e   : > { %1131 = vrot.lane.b32.xlu1 %v2792_v53, %s2318_s7  ;;  %1129 = vrot.lane.b32.xlu0 %v2795_v54, %s2318_s7  ;;  %v504_v48 = vmul.f32 %v2925_v58, %v486_v32  ;;  %v2974_v32 = vrot.slane %v2715_v16, %v523_v3 }
 0x130   : > { %v482_v44 = vpop.permute.xlu1 %481  ;;  %v480_v47 = vpop.permute.xlu0 %479 }
 0x131   : > { %v487_v49 = vsel %vm483_vm6, %v482_v44, %v476_v57  ;;  %v484_v50 = vsel %vm483_vm6, %v480_v47, %v482_v44  ;;  %v485_v51 = vsel %vm483_vm6, %v478_v56, %v480_v47  ;;  %v1905_v44 = vpack.c.bf16 %v504_v48, %v471_v2  ;;  %v3016_v2 = vld [vmem:[#allocation5 + $0x8] sm:$0xff] }
 0x132   : > { %v507_v45 = vmul.f32 %v2934_v12, %v487_v49  ;;  %v505_v46 = vmul.f32 %v2943_v33, %v485_v51  ;;  %v506_v52 = vmul.f32 %v2946_v34, %v484_v50  ;;  %1143 = vrot.lane.b32.xlu1 %v2770_v39, %s2319_s8  ;;  %1141 = vrot.lane.b32.xlu0 %v2773_v40, %s2319_s8 }
 0x134   : > { %v511_v57 = vpop.permute.xlu1 %510  ;;  %v509_v59 = vpop.permute.xlu0 %508  ;;  %v1903_v60 = vpack.c.bf16 %v505_v46, %v472_v42  ;;  %v1919_v56 = vpack.c.bf16 %v507_v45, %v474_v41  ;;  %v1921_v61 = vpack.c.bf16 %v506_v52, %v473_v43  ;;  %v2987_v41 = vrot.slane %v2718_v19, %v523_v3  ;;  %v3005_v46 = vld [vmem:[#allocation5] sm:$0xff] }
 0x135   : > { %v519_v16 = vsel %vm516_vm7, %v509_v59, %v511_v57 }
 0x136   : > { %1147 = vrot.lane.b32.xlu1 %v2792_v53, %s2319_s8  ;;  %1145 = vrot.lane.b32.xlu0 %v2795_v54, %s2319_s8  ;;  %v537_v50 = vmul.f32 %v2987_v41, %v519_v16 }
 0x137   : > { %1904 = vmatprep.subr.bf16.mxu0 %v1903_v60  ;;  %1920 = vmatprep.subr.bf16.mxu1 %v1919_v56  ;;  %v3030_v56 = vld [vmem:[#allocation5 + $0x10] sm:$0xff] }
 0x138   : > { %1906 = vmatpush1.bf16.msra.mxu0 %v1905_v44  ;;  %1922 = vmatpush1.bf16.msra.mxu1 %v1921_v61  ;;  %v515_v42 = vpop.permute.xlu1 %514  ;;  %v513_v43 = vpop.permute.xlu0 %512 }
 0x139   : > { %v520_v47 = vsel %vm516_vm7, %v515_v42, %v509_v59  ;;  %v517_v20 = vsel %vm516_vm7, %v513_v43, %v515_v42  ;;  %v518_v21 = vsel %vm516_vm7, %v511_v57, %v513_v43 }
 0x13a   : > { %1159 = vrot.lane.b32.xlu1 %v2770_v39, %s2320_s13  ;;  %1157 = vrot.lane.b32.xlu0 %v2773_v40, %s2320_s13  ;;  %v538_v19 = vmul.f32 %v2974_v32, %v518_v21  ;;  %v540_v48 = vmul.f32 %v2981_v10, %v520_v47  ;;  %v539_v49 = vmul.f32 %v2984_v38, %v517_v20  ;;  %v3048_v20 = vld [vmem:[%s2549_s26 + $0x68] sm:$0xff]  ;;  %v3051_v21 = vld [vmem:[%s2549_s26 + $0x60] sm:$0xff] }
 0x13b   : > { %3652 = vst [vmem:[#allocation16_spill] sm:$0xff] %v3051_v21 }
 0x13c   : > { %v752_v51 = vpop.permute.xlu1 %751  ;;  %v750_v45 = vpop.permute.xlu0 %749  ;;  %582 = vmatprep.subr.mxu0 %v538_v19  ;;  %665 = vmatprep.subr.mxu1 %v540_v48 }
 0x13d   : > { %583 = vmatpush1.msra.mxu0 %v537_v50  ;;  %666 = vmatpush1.msra.mxu1 %v539_v49  ;;  %v759_v57 = vsel %vm285_vm0, %v750_v45, %v752_v51 }
 0x13e   : > { %1163 = vrot.lane.b32.xlu1 %v2792_v53, %s2320_s13  ;;  %1161 = vrot.lane.b32.xlu0 %v2795_v54, %s2320_s13  ;;  %v762_v42 = vmul.f32 %v759_v57, %v2730_v22 }
 0x13f   : > { %1812 = vmatmul.mubr.msk.f32.vlgmr.msra.gmra.mrb[0].mxu0 %vm556_vm8, %v3005_v46  ;;  %1815 = vmatmul.mubr.msk.f32.vlgmr.msra.gmra.mrb[0].mxu1 %vm556_vm8, %v3005_v46 }
 0x140   : > { %v756_v52 = vpop.permute.xlu1 %755  ;;  %v754_v3 = vpop.permute.xlu0 %753  ;;  %636 = vmatprep.mubr.f32.mxu0 %v3633_v8  ;;  %719 = vmatprep.mubr.f32.mxu1 %v3633_v8 }
 0x141   : > { %v760_v61 = vsel %vm285_vm0, %v756_v52, %v750_v45  ;;  %v758_v44 = vsel %vm285_vm0, %v752_v51, %v754_v3  ;;  %v757_v43 = vsel %vm285_vm0, %v754_v3, %v756_v52 }
 0x142   : > { %1175 = vrot.lane.b32.xlu1 %v2770_v39, %s2321_s12  ;;  %1173 = vrot.lane.b32.xlu0 %v2773_v40, %s2321_s12  ;;  %v761_v19 = vmul.f32 %v760_v61, %v2738_v25  ;;  %v763_v48 = vmul.f32 %v758_v44, %v2750_v31  ;;  %v764_v45 = vmul.f32 %v757_v43, %v2744_v29 }
 0x143   : > { %1813 = vmatmul.mubr.msk.f32.gmra.mrb[2].mxu0 %vm556_vm8, %v3016_v2  ;;  %1816 = vmatmul.mubr.msk.f32.gmra.mrb[2].mxu1 %vm556_vm8, %v3016_v2 }
 0x144   : > { %v768_v59 = vpop.permute.xlu1 %767  ;;  %v766_v60 = vpop.permute.xlu0 %765  ;;  %642 = vmatprep.mubr.f32.mxu0 %v3633_v8  ;;  %725 = vmatprep.mubr.f32.mxu1 %v3633_v8 }
 0x145   : > { %v775_v16 = vsel %vm318_vm1, %v766_v60, %v768_v59 }
 0x146   : > { %v778_v47 = vmul.f32 %v775_v16, %v2733_v23  ;;  %1179 = vrot.lane.b32.xlu1 %v2792_v53, %s2321_s12  ;;  %1177 = vrot.lane.b32.xlu0 %v2795_v54, %s2321_s12 }
 0x147   : > { %1814 = vmatmul.mubr.msk.f32.gmra.mrb[4].mxu0 %vm556_vm8, %v3030_v56  ;;  %1817 = vmatmul.mubr.msk.f32.gmra.mrb[4].mxu1 %vm556_vm8, %v3030_v56 }
 0x148   : > { %v772_v49 = vpop.permute.xlu1 %771  ;;  %v770_v50 = vpop.permute.xlu0 %769  ;;  %v1923_v51 = vpack.c.bf16 %v778_v47, %v762_v42  ;;  %941 = vmatprep.mubr.f32.mxu0 %v3633_v8  ;;  %1024 = vmatprep.mubr.f32.mxu1 %v3633_v8  ;;  %v3079_v42 = vld [vmem:[%s2549_s26 + $0x70] sm:$0xff] }
 0x149   : > { %v776_v52 = vsel %vm318_vm1, %v772_v49, %v766_v60  ;;  %v773_v3 = vsel %vm318_vm1, %v770_v50, %v772_v49  ;;  %v774_v57 = vsel %vm318_vm1, %v768_v59, %v770_v50  ;;  %v3076_v60 = vld [vmem:[%s2549_s26 + $0x78] sm:$0xff]  ;;  %s2230_s26 = scalar_lea.vmem %s3575_s5, 6144 }
 0x14a   : > { %v777_v61 = vmul.f32 %v776_v52, %v2741_v28  ;;  %v779_v44 = vmul.f32 %v774_v57, %v2759_v35  ;;  %v780_v16 = vmul.f32 %v773_v3, %v2747_v30  ;;  %1375 = vrot.lane.b32.xlu1 %v3048_v20, %s2314_s21  ;;  %1373 = vrot.lane.b32.xlu0 %v3051_v21, %s2314_s21  ;;  %p2231_p10 = scmp.ne.s32.totalorder %s3575_s5, %s2230_s26 }
 0x14b   : > { %1924 = vmatprep.subr.bf16.mxu0 %v1923_v51 }
 0x14c   : > { %v1925_v43 = vpack.c.bf16 %v777_v61, %v761_v19  ;;  %v1941_v47 = vpack.c.bf16 %v779_v44, %v763_v48  ;;  %v784_v59 = vpop.permute.xlu1 %783  ;;  %v782_v49 = vpop.permute.xlu0 %781  ;;  %v1939_v50 = vpack.c.bf16 %v780_v16, %v764_v45  ;;  %p2232_p3 = pnand %p2231_p10, %p2497_p5 }
 0x14d   : > { %v791_v19 = vsel %vm351_vm2, %v782_v49, %v784_v59 }
 0x14e   : > { %1379 = vrot.lane.b32.xlu1 %v3076_v60, %s2314_s21  ;;  %1377 = vrot.lane.b32.xlu0 %v3079_v42, %s2314_s21  ;;  %v794_v44 = vmul.f32 %v791_v19, %v2805_v9  ;;  %p2233_p7 = pneg %p2232_p3  ;;  %s2324_s21 = smov [#allocation10]  }
 0x14f   : > { %1926 = vmatpush1.bf16.msra.mxu0 %v1925_v43  ;;  %1940 = vmatprep.subr.bf16.mxu1 %v1939_v50 }
 0x150   : > { %1942 = vmatpush1.bf16.msra.mxu1 %v1941_v47  ;;  %v788_v52 = vpop.permute.xlu1 %787  ;;  %v786_v51 = vpop.permute.xlu0 %785 }
 0x151   : > { %v792_v3 = vsel %vm351_vm2, %v788_v52, %v782_v49  ;;  %v790_v57 = vsel %vm351_vm2, %v784_v59, %v786_v51  ;;  %v789_v16 = vsel %vm351_vm2, %v786_v51, %v788_v52 }
 0x152   : > { %1391 = vrot.lane.b32.xlu1 %v3048_v20, %s2315_s23  ;;  %1389 = vrot.lane.b32.xlu0 %v3051_v21, %s2315_s23  ;;  %v793_v47 = vmul.f32 %v792_v3, %v2818_v14  ;;  %v795_v59 = vmul.f32 %v790_v57, %v2821_v15  ;;  %v796_v19 = vmul.f32 %v789_v16, %v2824_v17 }
 0x154   : > { %v800_v48 = vpop.permute.xlu1 %799  ;;  %v798_v45 = vpop.permute.xlu0 %797 }
 0x155   : > { %v807_v61 = vsel %vm384_vm3, %v798_v45, %v800_v48 }
 0x156   : > { %v810_v43 = vmul.f32 %v807_v61, %v2813_v11  ;;  %1395 = vrot.lane.b32.xlu1 %v3076_v60, %s2315_s23  ;;  %1393 = vrot.lane.b32.xlu0 %v3079_v42, %s2315_s23  ;;  %s2234_s23 = sshll.u32 %s2324_s21, 4  ;;  %s2235_s23 = int_to_ptr.vmem [resolvable:$false] %s2234_s23 }
 0x157   : > { %p2237_p12 = scmp.lt.s32.totalorder %s3575_s5, %s2235_s23 }
 0x158   : > { %v804_v49 = vpop.permute.xlu1 %803  ;;  %v802_v50 = vpop.permute.xlu0 %801  ;;  %v1927_v8 = vpack.c.bf16 %v810_v43, %v794_v44 }
 0x159   : > { %v808_v52 = vsel %vm384_vm3, %v804_v49, %v798_v45  ;;  %v805_v51 = vsel %vm384_vm3, %v802_v50, %v804_v49  ;;  %v806_v61 = vsel %vm384_vm3, %v800_v48, %v802_v50 }
 0x15a   : > { %v809_v40 = vmul.f32 %v808_v52, %v2827_v26  ;;  %v811_v3 = vmul.f32 %v806_v61, %v2830_v27  ;;  %v812_v57 = vmul.f32 %v805_v51, %v2839_v36  ;;  %1407 = vrot.lane.b32.xlu1 %v3048_v20, %s2316_s29  ;;  %1405 = vrot.lane.b32.xlu0 %v3051_v21, %s2316_s29 }
 0x15b   : > { %1928 = vmatprep.subr.bf16.mxu0 %v1927_v8 }
 0x15c   : > { %v1929_v45 = vpack.c.bf16 %v809_v40, %v793_v47  ;;  %v1945_v44 = vpack.c.bf16 %v811_v3, %v795_v59  ;;  %v816_v16 = vpop.permute.xlu1 %815  ;;  %v814_v43 = vpop.permute.xlu0 %813  ;;  %v1943_v49 = vpack.c.bf16 %v812_v57, %v796_v19 }
 0x15d   : > { %v823_v48 = vsel %vm417_vm4, %v814_v43, %v816_v16 }
 0x15e   : > { %1411 = vrot.lane.b32.xlu1 %v3076_v60, %s2316_s29  ;;  %1409 = vrot.lane.b32.xlu0 %v3079_v42, %s2316_s29  ;;  %v825_v8 = vmul.f32 %v823_v48, %v2868_v62  ;;  %s2236_s29 = scalar_lea.vmem %s2235_s23, 12288 }
 0x15f   : > { %1930 = vmatpush1.bf16.msra.mxu0 %v1929_v45  ;;  %1944 = vmatprep.subr.bf16.mxu1 %v1943_v49  ;;  %p2238_p2 = scmp.lt.s32.totalorder %s2236_s29, %s2230_s26 }
 0x160   : > { %1946 = vmatpush1.bf16.msra.mxu1 %v1945_v44  ;;  %v820_v50 = vpop.permute.xlu1 %819  ;;  %v818_v52 = vpop.permute.xlu0 %817 }
 0x161   : > { %v824_v40 = vsel %vm417_vm4, %v820_v50, %v814_v43  ;;  %v821_v47 = vsel %vm417_vm4, %v818_v52, %v820_v50  ;;  %v822_v59 = vsel %vm417_vm4, %v816_v16, %v818_v52  ;;  %v1933_v43 = vpack.c.bf16 %v825_v8, %v2643_v5  ;;  %p2239_p1 = por %p2238_p2, %p2237_p12 }
 0x162   : > { %v828_v19 = vmul.f32 %v824_v40, %v2871_v63  ;;  %v826_v51 = vmul.f32 %v822_v59, %v2880_v18  ;;  %v827_v61 = vmul.f32 %v821_v47, %v2883_v24  ;;  %1423 = vrot.lane.b32.xlu1 %v3048_v20, %s2317_s6  ;;  %1421 = vrot.lane.b32.xlu0 %v3051_v21, %s2317_s6 }
 0x163   : > { %p2240_p4 = pnand %p2239_p1, %p2233_p7 }
 0x164   : > { %v1949_v3 = vpack.c.bf16 %v827_v61, %v2653_v7  ;;  %v832_v57 = vpop.permute.xlu1 %831  ;;  %v830_v45 = vpop.permute.xlu0 %829  ;;  %v1931_v44 = vpack.c.bf16 %v826_v51, %v2640_v4  ;;  %v1947_v16 = vpack.c.bf16 %v828_v19, %v2650_v6 }
 0x165   : > { %v839_v8 = vsel %vm450_vm5, %v830_v45, %v832_v57 }
 0x166   : > { %1427 = vrot.lane.b32.xlu1 %v3076_v60, %s2317_s6  ;;  %1425 = vrot.lane.b32.xlu0 %v3079_v42, %s2317_s6 }
 0x167   : > { %1932 = vmatprep.subr.bf16.mxu0 %v1931_v44  ;;  %1948 = vmatprep.subr.bf16.mxu1 %v1947_v16 }
 0x168   : > { %1934 = vmatpush1.bf16.msra.mxu0 %v1933_v43  ;;  %1950 = vmatpush1.bf16.msra.mxu1 %v1949_v3  ;;  %v836_v49 = vpop.permute.xlu1 %835  ;;  %v834_v7 = vpop.permute.xlu0 %833 }
 0x169   : > { %v840_v6 = vsel %vm450_vm5, %v836_v49, %v830_v45  ;;  %v837_v48 = vsel %vm450_vm5, %v834_v7, %v836_v49  ;;  %v838_v50 = vsel %vm450_vm5, %v832_v57, %v834_v7  ;;  %v841_v49 = vmul.f32 %v839_v8, %v2949_v37 }
 0x16a   : > { %1439 = vrot.lane.b32.xlu1 %v3048_v20, %s2318_s7  ;;  %1437 = vrot.lane.b32.xlu0 %v3051_v21, %s2318_s7  ;;  %v844_v40 = vmul.f32 %v840_v6, %v2916_v0  ;;  %v842_v47 = vmul.f32 %v838_v50, %v2919_v1  ;;  %v843_v59 = vmul.f32 %v837_v48, %v2922_v55 }
 0x16c   : > { %v848_v4 = vpop.permute.xlu1 %847  ;;  %v846_v5 = vpop.permute.xlu0 %845 }
 0x16d   : > { %v855_v52 = vsel %vm483_vm6, %v846_v5, %v848_v4 }
 0x16e   : > { %1443 = vrot.lane.b32.xlu1 %v3076_v60, %s2318_s7  ;;  %1441 = vrot.lane.b32.xlu0 %v3079_v42, %s2318_s7  ;;  %v857_v61 = vmul.f32 %v855_v52, %v2925_v58 }
 0x170   : > { %v852_v19 = vpop.permute.xlu1 %851  ;;  %v850_v51 = vpop.permute.xlu0 %849 }
 0x171   : > { %v856_v3 = vsel %vm483_vm6, %v852_v19, %v846_v5  ;;  %v853_v44 = vsel %vm483_vm6, %v850_v51, %v852_v19  ;;  %v854_v16 = vsel %vm483_vm6, %v848_v4, %v850_v51  ;;  %v1937_v4 = vpack.c.bf16 %v857_v61, %v841_v49 }
 0x172   : > { %v860_v57 = vmul.f32 %v856_v3, %v2934_v12  ;;  %v858_v45 = vmul.f32 %v854_v16, %v2943_v33  ;;  %v859_v43 = vmul.f32 %v853_v44, %v2946_v34  ;;  %1455 = vrot.lane.b32.xlu1 %v3048_v20, %s2319_s8  ;;  %1453 = vrot.lane.b32.xlu0 %v3051_v21, %s2319_s8  ;;  %v3653_v49 = vmov 0.0  }
 0x174   : > { %v1953_v7 = vpack.c.bf16 %v859_v43, %v843_v59  ;;  %v864_v5 = vpop.permute.xlu1 %863  ;;  %v862_v6 = vpop.permute.xlu0 %861  ;;  %v1935_v48 = vpack.c.bf16 %v858_v45, %v842_v47  ;;  %v1951_v50 = vpack.c.bf16 %v860_v57, %v844_v40 }
 0x175   : > { %v871_v52 = vsel %vm516_vm7, %v862_v6, %v864_v5 }
 0x176   : > { %1459 = vrot.lane.b32.xlu1 %v3076_v60, %s2319_s8  ;;  %1457 = vrot.lane.b32.xlu0 %v3079_v42, %s2319_s8  ;;  %v873_v44 = vmul.f32 %v871_v52, %v2987_v41 }
 0x177   : > { %1936 = vmatprep.subr.bf16.mxu0 %v1935_v48  ;;  %1952 = vmatprep.subr.bf16.mxu1 %v1951_v50 }
 0x178   : > { %1938 = vmatpush1.bf16.msra.mxu0 %v1937_v4  ;;  %1954 = vmatpush1.bf16.msra.mxu1 %v1953_v7  ;;  %v868_v8 = vpop.permute.xlu1 %867  ;;  %v866_v59 = vpop.permute.xlu0 %865 }
 0x179   : > { %v872_v47 = vsel %vm516_vm7, %v868_v8, %v862_v6  ;;  %v869_v40 = vsel %vm516_vm7, %v866_v59, %v868_v8  ;;  %v870_v19 = vsel %vm516_vm7, %v864_v5, %v866_v59 }
 0x17a   : > { %v876_v51 = vmul.f32 %v872_v47, %v2981_v10  ;;  %v874_v61 = vmul.f32 %v870_v19, %v2974_v32  ;;  %v875_v3 = vmul.f32 %v869_v40, %v2984_v38  ;;  %1471 = vrot.lane.b32.xlu1 %v3048_v20, %s2320_s13  ;;  %1469 = vrot.lane.b32.xlu0 %v3051_v21, %s2320_s13  ;;  %v268_v40 = vld [vmem:[#allocation7] sm:$0xff] }
 0x17c   : > { %v1064_v16 = vpop.permute.xlu1 %1063  ;;  %v1062_v57 = vpop.permute.xlu0 %1061  ;;  %893 = vmatprep.subr.mxu0 %v874_v61  ;;  %976 = vmatprep.subr.mxu1 %v876_v51 }
 0x17d   : > { %894 = vmatpush1.msra.mxu0 %v873_v44  ;;  %977 = vmatpush1.msra.mxu1 %v875_v3  ;;  %v1071_v7 = vsel %vm285_vm0, %v1062_v57, %v1064_v16 }
 0x17e   : > { %1475 = vrot.lane.b32.xlu1 %v3076_v60, %s2320_s13  ;;  %1473 = vrot.lane.b32.xlu0 %v3079_v42, %s2320_s13  ;;  %v1074_v8 = vmul.f32 %v1071_v7, %v2730_v22  ;;  %v2323_v7 = vmov 0  }
 0x17f   : > { %1822 = vmatmul.mubr.msk.f32.vlgmr.msra.gmra.mrb[6].mxu0 %vm556_vm8, %v3005_v46  ;;  %1825 = vmatmul.mubr.msk.f32.vlgmr.msra.gmra.mrb[6].mxu1 %vm556_vm8, %v3005_v46 }
 0x180   : > { %v1068_v45 = vpop.permute.xlu1 %1067  ;;  %v1066_v43 = vpop.permute.xlu0 %1065  ;;  %947 = vmatprep.mubr.f32.mxu0 %v3653_v49  ;;  %1030 = vmatprep.mubr.f32.mxu1 %v3653_v49 }
 0x181   : > { %v1072_v5 = vsel %vm285_vm0, %v1068_v45, %v1062_v57  ;;  %v1069_v50 = vsel %vm285_vm0, %v1066_v43, %v1068_v45  ;;  %v1070_v4 = vsel %vm285_vm0, %v1064_v16, %v1066_v43  ;;  %v269_v16 = vld [vmem:[#allocation7 + $0x8] sm:$0xff]  ;;  %2114 = vset.pattern.permute.xlu0 %v2323_v7  ;;  %2115 = vset.pattern.permute.xlu1 %v2323_v7 }
 0x182   : > { %1487 = vrot.lane.b32.xlu1 %v3048_v20, %s2321_s12  ;;  %1485 = vrot.lane.b32.xlu0 %v3051_v21, %s2321_s12  ;;  %v1073_v47 = vmul.f32 %v1072_v5, %v2738_v25  ;;  %v1075_v19 = vmul.f32 %v1070_v4, %v2750_v31  ;;  %v1076_v51 = vmul.f32 %v1069_v50, %v2744_v29  ;;  %v270_v21 = vld [vmem:[#allocation7 + $0x10] sm:$0xff] }
 0x183   : > { %1823 = vmatmul.mubr.msk.f32.gmra.mrb[8].mxu0 %vm556_vm8, %v3016_v2  ;;  %1826 = vmatmul.mubr.msk.f32.gmra.mrb[8].mxu1 %vm556_vm8, %v3016_v2 }
 0x184   : > { %v1080_v6 = vpop.permute.xlu1 %1079  ;;  %v1078_v48 = vpop.permute.xlu0 %1077  ;;  %953 = vmatprep.mubr.f32.mxu0 %v3653_v49  ;;  %1036 = vmatprep.mubr.f32.mxu1 %v3653_v49 }
 0x185   : > { %v1087_v52 = vsel %vm318_vm1, %v1078_v48, %v1080_v6 }
 0x186   : > { %v1090_v59 = vmul.f32 %v1087_v52, %v2733_v23  ;;  %1491 = vrot.lane.b32.xlu1 %v3076_v60, %s2321_s12  ;;  %1489 = vrot.lane.b32.xlu0 %v3079_v42, %s2321_s12 }
 0x187   : > { %1824 = vmatmul.mubr.msk.f32.gmra.mrb[10].mxu0 %vm556_vm8, %v3030_v56  ;;  %1827 = vmatmul.mubr.msk.f32.gmra.mrb[10].mxu1 %vm556_vm8, %v3030_v56 }
 0x188   : > { %v1084_v61 = vpop.permute.xlu1 %1083  ;;  %v1082_v3 = vpop.permute.xlu0 %1081  ;;  %v1955_v44 = vpack.c.bf16 %v1090_v59, %v1074_v8  ;;  %1253 = vmatprep.mubr.f32.mxu0 %v3653_v49  ;;  %1336 = vmatprep.mubr.f32.mxu1 %v3653_v49 }
 0x189   : > { %v1088_v57 = vsel %vm318_vm1, %v1084_v61, %v1078_v48  ;;  %v1085_v45 = vsel %vm318_vm1, %v1082_v3, %v1084_v61  ;;  %v1086_v43 = vsel %vm318_vm1, %v1080_v6, %v1082_v3 }
 0x18a   : > { %v1089_v5 = vmul.f32 %v1088_v57, %v2741_v28  ;;  %v1091_v50 = vmul.f32 %v1086_v43, %v2759_v35  ;;  %v1092_v4 = vmul.f32 %v1085_v45, %v2747_v30  ;;  %1956 = vmatprep.subr.bf16.mxu0 %v1955_v44  ;;  %543 = vperm.xlu0 %2114, %v268_v40  }
 0x18b   : > { %548 = vperm.xlu1 %2115, %v269_v16  }
 0x18c   : > { %v1957_v52 = vpack.c.bf16 %v1089_v5, %v1073_v47  ;;  %v1973_v48 = vpack.c.bf16 %v1091_v50, %v1075_v19  ;;  %v1096_v8 = vpop.permute.xlu1 %1095  ;;  %v1094_v59 = vpop.permute.xlu0 %1093  ;;  %v1971_v61 = vpack.c.bf16 %v1092_v4, %v1076_v51 }
 0x18d   : > { %v1103_v57 = vsel %vm351_vm2, %v1094_v59, %v1096_v8 }
 0x18e   : > { %1958 = vmatpush1.bf16.msra.mxu0 %v1957_v52  ;;  %1972 = vmatprep.subr.bf16.mxu1 %v1971_v61  ;;  %v1106_v19 = vmul.f32 %v1103_v57, %v2805_v9 }
 0x18f   : > { %1974 = vmatpush1.bf16.msra.mxu1 %v1973_v48  ;;  %553 = vperm.xlu1 %2115, %v270_v21  }
 0x190   : > { %v1100_v6 = vpop.permute.xlu1 %1099  ;;  %v1098_v3 = vpop.permute.xlu0 %1097 }
 0x191   : > { %v1104_v40 = vsel %vm351_vm2, %v1100_v6, %v1094_v59  ;;  %v1102_v51 = vsel %vm351_vm2, %v1096_v8, %v1098_v3  ;;  %v1101_v44 = vsel %vm351_vm2, %v1098_v3, %v1100_v6 }
 0x192   : > { %v1105_v16 = vmul.f32 %v1104_v40, %v2818_v14  ;;  %v1107_v4 = vmul.f32 %v1102_v51, %v2821_v15  ;;  %v1108_v59 = vmul.f32 %v1101_v44, %v2824_v17 }
 0x194   : > { %v1112_v43 = vpop.permute.xlu1 %1111  ;;  %v1110_v45 = vpop.permute.xlu0 %1109 }
 0x195   : > { %v1119_v47 = vsel %vm384_vm3, %v1110_v45, %v1112_v43 }
 0x196   : > { %v1122_v21 = vmul.f32 %v1119_v47, %v2813_v11 }
 0x198   : > { %v1116_v7 = vpop.permute.xlu1 %1115  ;;  %v1114_v5 = vpop.permute.xlu0 %1113  ;;  %v1959_v50 = vpack.c.bf16 %v1122_v21, %v1106_v19 }
 0x199   : > { %v1120_v52 = vsel %vm384_vm3, %v1116_v7, %v1110_v45  ;;  %v1117_v48 = vsel %vm384_vm3, %v1114_v5, %v1116_v7  ;;  %v1118_v8 = vsel %vm384_vm3, %v1112_v43, %v1114_v5 }
 0x19a   : > { %v1121_v61 = vmul.f32 %v1120_v52, %v2827_v26  ;;  %v1123_v6 = vmul.f32 %v1118_v8, %v2830_v27  ;;  %v1124_v3 = vmul.f32 %v1117_v48, %v2839_v36  ;;  %1960 = vmatprep.subr.bf16.mxu0 %v1959_v50 }
 0x19c   : > { %v1961_v57 = vpack.c.bf16 %v1121_v61, %v1105_v16  ;;  %v1977_v40 = vpack.c.bf16 %v1123_v6, %v1107_v4  ;;  %v1128_v47 = vpop.permute.xlu1 %1127  ;;  %v1126_v19 = vpop.permute.xlu0 %1125  ;;  %v1975_v45 = vpack.c.bf16 %v1124_v3, %v1108_v59  ;;  %v3654_v3 = vld [vmem:[#allocation15_spill] sm:$0xff] }
 0x19d   : > { %v1135_v51 = vsel %vm417_vm4, %v1126_v19, %v1128_v47 }
 0x19e   : > { %1962 = vmatpush1.bf16.msra.mxu0 %v1961_v57  ;;  %1976 = vmatprep.subr.bf16.mxu1 %v1975_v45  ;;  %v1137_v44 = vmul.f32 %v1135_v51, %v2868_v62 }
 0x19f   : > { %1978 = vmatpush1.bf16.msra.mxu1 %v1977_v40 }
 0x1a0   : > { %v1132_v43 = vpop.permute.xlu1 %1131  ;;  %v1130_v21 = vpop.permute.xlu0 %1129  ;;  %v1965_v57 = vpack.c.bf16 %v1137_v44, %v3654_v3 }
 0x1a1   : > { %v1136_v7 = vsel %vm417_vm4, %v1132_v43, %v1126_v19  ;;  %v1133_v16 = vsel %vm417_vm4, %v1130_v21, %v1132_v43  ;;  %v1134_v5 = vsel %vm417_vm4, %v1128_v47, %v1130_v21 }
 0x1a2   : > { %v1140_v50 = vmul.f32 %v1136_v7, %v2871_v63  ;;  %v1138_v4 = vmul.f32 %v1134_v5, %v2880_v18  ;;  %v1139_v52 = vmul.f32 %v1133_v16, %v2883_v24 }
 0x1a4   : > { %v1981_v48 = vpack.c.bf16 %v1139_v52, %v2795_v54  ;;  %v1144_v8 = vpop.permute.xlu1 %1143  ;;  %v1142_v59 = vpop.permute.xlu0 %1141  ;;  %v1963_v61 = vpack.c.bf16 %v1138_v4, %v2770_v39  ;;  %v1979_v6 = vpack.c.bf16 %v1140_v50, %v2792_v53 }
 0x1a5   : > { %v1151_v43 = vsel %vm450_vm5, %v1142_v59, %v1144_v8 }
 0x1a6   : > { %1964 = vmatprep.subr.bf16.mxu0 %v1963_v61  ;;  %1980 = vmatprep.subr.bf16.mxu1 %v1979_v6  ;;  %v1153_v6 = vmul.f32 %v1151_v43, %v2949_v37 }
 0x1a7   : > { %1966 = vmatpush1.bf16.msra.mxu0 %v1965_v57  ;;  %1982 = vmatpush1.bf16.msra.mxu1 %v1981_v48 }
 0x1a8   : > { %v1148_v40 = vpop.permute.xlu1 %1147  ;;  %v1146_v47 = vpop.permute.xlu0 %1145 }
 0x1a9   : > { %v1152_v51 = vsel %vm450_vm5, %v1148_v40, %v1142_v59  ;;  %v1150_v54 = vsel %vm450_vm5, %v1144_v8, %v1146_v47  ;;  %v1149_v53 = vsel %vm450_vm5, %v1146_v47, %v1148_v40 }
 0x1aa   : > { %v1156_v21 = vmul.f32 %v1152_v51, %v2916_v0  ;;  %v1154_v44 = vmul.f32 %v1150_v54, %v2919_v1  ;;  %v1155_v48 = vmul.f32 %v1149_v53, %v2922_v55 }
 0x1ac   : > { %v1160_v19 = vpop.permute.xlu1 %1159  ;;  %v1158_v45 = vpop.permute.xlu0 %1157 }
 0x1ad   : > { %v1167_v39 = vsel %vm483_vm6, %v1158_v45, %v1160_v19 }
 0x1ae   : > { %v1169_v5 = vmul.f32 %v1167_v39, %v2925_v58 }
 0x1b0   : > { %v1164_v7 = vpop.permute.xlu1 %1163  ;;  %v1162_v16 = vpop.permute.xlu0 %1161  ;;  %v1969_v51 = vpack.c.bf16 %v1169_v5, %v1153_v6 }
 0x1b1   : > { %v1168_v50 = vsel %vm483_vm6, %v1164_v7, %v1158_v45  ;;  %v1165_v4 = vsel %vm483_vm6, %v1162_v16, %v1164_v7  ;;  %v1166_v52 = vsel %vm483_vm6, %v1160_v19, %v1162_v16 }
 0x1b2   : > { %v1172_v8 = vmul.f32 %v1168_v50, %v2934_v12  ;;  %v1170_v59 = vmul.f32 %v1166_v52, %v2943_v33  ;;  %v1171_v61 = vmul.f32 %v1165_v4, %v2946_v34 }
 0x1b4   : > { %v1985_v3 = vpack.c.bf16 %v1171_v61, %v1155_v48  ;;  %v1176_v57 = vpop.permute.xlu1 %1175  ;;  %v1174_v40 = vpop.permute.xlu0 %1173  ;;  %v1967_v47 = vpack.c.bf16 %v1170_v59, %v1154_v44  ;;  %v1983_v45 = vpack.c.bf16 %v1172_v8, %v1156_v21 }
 0x1b5   : > { %v1183_v19 = vsel %vm516_vm7, %v1174_v40, %v1176_v57 }
 0x1b6   : > { %1968 = vmatprep.subr.bf16.mxu0 %v1967_v47  ;;  %1984 = vmatprep.subr.bf16.mxu1 %v1983_v45  ;;  %v1185_v5 = vmul.f32 %v1183_v19, %v2987_v41 }
 0x1b7   : > { %1970 = vmatpush1.bf16.msra.mxu0 %v1969_v51  ;;  %1986 = vmatpush1.bf16.msra.mxu1 %v1985_v3 }
 0x1b8   : > { %v1180_v54 = vpop.permute.xlu1 %1179  ;;  %v1178_v39 = vpop.permute.xlu0 %1177 }
 0x1b9   : > { %v1184_v53 = vsel %vm516_vm7, %v1180_v54, %v1174_v40  ;;  %v1181_v43 = vsel %vm516_vm7, %v1178_v39, %v1180_v54  ;;  %v1182_v44 = vsel %vm516_vm7, %v1176_v57, %v1178_v39 }
 0x1ba   : > { %v1188_v21 = vmul.f32 %v1184_v53, %v2981_v10  ;;  %v1186_v7 = vmul.f32 %v1182_v44, %v2974_v32  ;;  %v1187_v16 = vmul.f32 %v1181_v43, %v2984_v38 }
 0x1bc   : > { %v1376_v50 = vpop.permute.xlu1 %1375  ;;  %v1374_v4 = vpop.permute.xlu0 %1373  ;;  %1205 = vmatprep.subr.mxu0 %v1186_v7  ;;  %1288 = vmatprep.subr.mxu1 %v1188_v21 }
 0x1bd   : > { %1206 = vmatpush1.msra.mxu0 %v1185_v5  ;;  %1289 = vmatpush1.msra.mxu1 %v1187_v16  ;;  %v1383_v8 = vsel %vm285_vm0, %v1374_v4, %v1376_v50 }
 0x1be   : > { %1844 = vmatmul.mubr.msk.f32.vlgmr.msra.gmra.mrb[12].mxu0 %vm556_vm8, %v3005_v46  ;;  %1847 = vmatmul.mubr.msk.f32.vlgmr.msra.gmra.mrb[12].mxu1 %vm556_vm8, %v3005_v46  ;;  %v1386_v57 = vmul.f32 %v1383_v8, %v2730_v22 }
 0x1bf   : > { %1259 = vmatprep.mubr.f32.mxu0 %v3653_v49  ;;  %1342 = vmatprep.mubr.f32.mxu1 %v3653_v49 }
 0x1c0   : > { %v1380_v52 = vpop.permute.xlu1 %1379  ;;  %v1378_v48 = vpop.permute.xlu0 %1377 }
 0x1c1   : > { %v1384_v6 = vsel %vm285_vm0, %v1380_v52, %v1374_v4  ;;  %v1382_v40 = vsel %vm285_vm0, %v1376_v50, %v1378_v48  ;;  %v1381_v45 = vsel %vm285_vm0, %v1378_v48, %v1380_v52 }
 0x1c2   : > { %1845 = vmatmul.mubr.msk.f32.gmra.mrb[14].mxu0 %vm556_vm8, %v3016_v2  ;;  %1848 = vmatmul.mubr.msk.f32.gmra.mrb[14].mxu1 %vm556_vm8, %v3016_v2  ;;  %v1385_v22 = vmul.f32 %v1384_v6, %v2738_v25  ;;  %v1388_v44 = vmul.f32 %v1381_v45, %v2744_v29 }
 0x1c3   : > { %1265 = vmatprep.mubr.f32.mxu0 %v3653_v49  ;;  %1348 = vmatprep.mubr.f32.mxu1 %v3653_v49 }
 0x1c4   : > { %v1392_v59 = vpop.permute.xlu1 %1391  ;;  %v1390_v61 = vpop.permute.xlu0 %1389 }
 0x1c5   : > { %v1399_v3 = vsel %vm318_vm1, %v1390_v61, %v1392_v59 }
 0x1c6   : > { %v1402_v47 = vmul.f32 %v1399_v3, %v2733_v23  ;;  %1846 = vmatmul.mubr.msk.f32.gmra.mrb[16].mxu0 %vm556_vm8, %v3030_v56  ;;  %1849 = vmatmul.mubr.msk.f32.gmra.mrb[16].mxu1 %vm556_vm8, %v3030_v56  ;;  %v1387_v23 = vmul.f32 %v1382_v40, %v2750_v31 }
 0x1c7   : > { %1565 = vmatprep.mubr.f32.mxu0 %v3653_v49  ;;  %1648 = vmatprep.mubr.f32.mxu1 %v3653_v49 }
 0x1c8   : > { %v1396_v51 = vpop.permute.xlu1 %1395  ;;  %v1394_v19 = vpop.permute.xlu0 %1393  ;;  %v1987_v54 = vpack.c.bf16 %v1402_v47, %v1386_v57 }
 0x1c9   : > { %v1400_v39 = vsel %vm318_vm1, %v1396_v51, %v1390_v61  ;;  %v1397_v53 = vsel %vm318_vm1, %v1394_v19, %v1396_v51  ;;  %v1398_v43 = vsel %vm318_vm1, %v1392_v59, %v1394_v19 }
 0x1ca   : > { %v1401_v21 = vmul.f32 %v1400_v39, %v2741_v28  ;;  %v1403_v25 = vmul.f32 %v1398_v43, %v2759_v35  ;;  %v1404_v7 = vmul.f32 %v1397_v53, %v2747_v30  ;;  %1988 = vmatprep.subr.bf16.mxu0 %v1987_v54 }
 0x1cc   : > { %v1989_v16 = vpack.c.bf16 %v1401_v21, %v1385_v22  ;;  %v2005_v31 = vpack.c.bf16 %v1403_v25, %v1387_v23  ;;  %v1408_v5 = vpop.permute.xlu1 %1407  ;;  %v1406_v50 = vpop.permute.xlu0 %1405  ;;  %v2003_v4 = vpack.c.bf16 %v1404_v7, %v1388_v44 }
 0x1cd   : > { %v1415_v29 = vsel %vm351_vm2, %v1406_v50, %v1408_v5 }
 0x1ce   : > { %1990 = vmatpush1.bf16.msra.mxu0 %v1989_v16  ;;  %2004 = vmatprep.subr.bf16.mxu1 %v2003_v4  ;;  %v1418_v59 = vmul.f32 %v1415_v29, %v2805_v9  ;;  %v3655_v29 = vld [vmem:[#allocation16_spill] sm:$0xff] }
 0x1cf   : > { %2006 = vmatpush1.bf16.msra.mxu1 %v2005_v31 }
 0x1d0   : > { %v1412_v52 = vpop.permute.xlu1 %1411  ;;  %v1410_v48 = vpop.permute.xlu0 %1409 }
 0x1d1   : > { %v1416_v35 = vsel %vm351_vm2, %v1412_v52, %v1406_v50  ;;  %v1414_v61 = vsel %vm351_vm2, %v1408_v5, %v1410_v48  ;;  %v1413_v3 = vsel %vm351_vm2, %v1410_v48, %v1412_v52 }
 0x1d2   : > { %v1417_v57 = vmul.f32 %v1416_v35, %v2818_v14  ;;  %v1419_v22 = vmul.f32 %v1414_v61, %v2821_v15 }
 0x1d4   : > { %v1424_v8 = vpop.permute.xlu1 %1423  ;;  %v1422_v28 = vpop.permute.xlu0 %1421 }
 0x1d5   : > { %v1431_v30 = vsel %vm384_vm3, %v1422_v28, %v1424_v8 }
 0x1d6   : > { %v1434_v6 = vmul.f32 %v1431_v30, %v2813_v11  ;;  %v1420_v11 = vmul.f32 %v1413_v3, %v2824_v17 }
 0x1d8   : > { %v1428_v40 = vpop.permute.xlu1 %1427  ;;  %v1426_v47 = vpop.permute.xlu0 %1425  ;;  %v1991_v45 = vpack.c.bf16 %v1434_v6, %v1418_v59 }
 0x1d9   : > { %v1432_v51 = vsel %vm384_vm3, %v1428_v40, %v1422_v28  ;;  %v1429_v9 = vsel %vm384_vm3, %v1426_v47, %v1428_v40  ;;  %v1430_v19 = vsel %vm384_vm3, %v1424_v8, %v1426_v47 }
 0x1da   : > { %v1433_v54 = vmul.f32 %v1432_v51, %v2827_v26  ;;  %v1435_v14 = vmul.f32 %v1430_v19, %v2830_v27  ;;  %v1436_v23 = vmul.f32 %v1429_v9, %v2839_v36  ;;  %1992 = vmatprep.subr.bf16.mxu0 %v1991_v45 }
 0x1dc   : > { %v1993_v39 = vpack.c.bf16 %v1433_v54, %v1417_v57  ;;  %v2009_v15 = vpack.c.bf16 %v1435_v14, %v1419_v22  ;;  %v1440_v53 = vpop.permute.xlu1 %1439  ;;  %v1438_v43 = vpop.permute.xlu0 %1437  ;;  %v2007_v44 = vpack.c.bf16 %v1436_v23, %v1420_v11 }
 0x1dd   : > { %v1447_v21 = vsel %vm417_vm4, %v1438_v43, %v1440_v53 }
 0x1de   : > { %1994 = vmatpush1.bf16.msra.mxu0 %v1993_v39  ;;  %2008 = vmatprep.subr.bf16.mxu1 %v2007_v44  ;;  %v1449_v26 = vmul.f32 %v1447_v21, %v2868_v62 }
 0x1df   : > { %2010 = vmatpush1.bf16.msra.mxu1 %v2009_v15 }
 0x1e0   : > { %v1444_v25 = vpop.permute.xlu1 %1443  ;;  %v1442_v17 = vpop.permute.xlu0 %1441  ;;  %v1997_v8 = vpack.c.bf16 %v1449_v26, %v3655_v29 }
 0x1e1   : > { %v1448_v27 = vsel %vm417_vm4, %v1444_v25, %v1438_v43  ;;  %v1445_v36 = vsel %vm417_vm4, %v1442_v17, %v1444_v25  ;;  %v1446_v7 = vsel %vm417_vm4, %v1440_v53, %v1442_v17 }
 0x1e2   : > { %v1452_v16 = vmul.f32 %v1448_v27, %v2871_v63  ;;  %v1450_v31 = vmul.f32 %v1446_v7, %v2880_v18  ;;  %v1451_v5 = vmul.f32 %v1445_v36, %v2883_v24 }
 0x1e4   : > { %v2013_v50 = vpack.c.bf16 %v1451_v5, %v3079_v42  ;;  %v1456_v4 = vpop.permute.xlu1 %1455  ;;  %v1454_v52 = vpop.permute.xlu0 %1453  ;;  %v1995_v62 = vpack.c.bf16 %v1450_v31, %v3048_v20  ;;  %v2011_v48 = vpack.c.bf16 %v1452_v16, %v3076_v60 }
 0x1e5   : > { %v1463_v30 = vsel %vm450_vm5, %v1454_v52, %v1456_v4 }
 0x1e6   : > { %1996 = vmatprep.subr.bf16.mxu0 %v1995_v62  ;;  %2012 = vmatprep.subr.bf16.mxu1 %v2011_v48  ;;  %v1465_v9 = vmul.f32 %v1463_v30, %v2949_v37 }
 0x1e7   : > { %1998 = vmatpush1.bf16.msra.mxu0 %v1997_v8  ;;  %2014 = vmatpush1.bf16.msra.mxu1 %v2013_v50 }
 0x1e8   : > { %v1460_v28 = vpop.permute.xlu1 %1459  ;;  %v1458_v63 = vpop.permute.xlu0 %1457 }
 0x1e9   : > { %v1464_v24 = vsel %vm450_vm5, %v1460_v28, %v1454_v52  ;;  %v1462_v42 = vsel %vm450_vm5, %v1456_v4, %v1458_v63  ;;  %v1461_v60 = vsel %vm450_vm5, %v1458_v63, %v1460_v28 }
 0x1ea   : > { %v1468_v59 = vmul.f32 %v1464_v24, %v2916_v0  ;;  %v1466_v61 = vmul.f32 %v1462_v42, %v2919_v1  ;;  %v1467_v22 = vmul.f32 %v1461_v60, %v2922_v55 }
 0x1ec   : > { %v1472_v35 = vpop.permute.xlu1 %1471  ;;  %v1470_v18 = vpop.permute.xlu0 %1469 }
 0x1ed   : > { %v1479_v20 = vsel %vm483_vm6, %v1470_v18, %v1472_v35 }
 0x1ee   : > { %v1481_v57 = vmul.f32 %v1479_v20, %v2925_v58 }
 0x1f0   : > { %v1476_v6 = vpop.permute.xlu1 %1475  ;;  %v1474_v3 = vpop.permute.xlu0 %1473  ;;  %v2001_v23 = vpack.c.bf16 %v1481_v57, %v1465_v9 }
 0x1f1   : > { %v1480_v40 = vsel %vm483_vm6, %v1476_v6, %v1470_v18  ;;  %v1477_v47 = vsel %vm483_vm6, %v1474_v3, %v1476_v6  ;;  %v1478_v45 = vsel %vm483_vm6, %v1472_v35, %v1474_v3 }
 0x1f2   : > { %v1484_v51 = vmul.f32 %v1480_v40, %v2934_v12  ;;  %v1482_v0 = vmul.f32 %v1478_v45, %v2943_v33  ;;  %v1483_v1 = vmul.f32 %v1477_v47, %v2946_v34 }
 0x1f4   : > { %v2017_v58 = vpack.c.bf16 %v1483_v1, %v1467_v22  ;;  %v1488_v19 = vpop.permute.xlu1 %1487  ;;  %v1486_v11 = vpop.permute.xlu0 %1485  ;;  %v1999_v54 = vpack.c.bf16 %v1482_v0, %v1466_v61  ;;  %v2015_v14 = vpack.c.bf16 %v1484_v51, %v1468_v59 }
 0x1f5   : > { %v1495_v55 = vsel %vm516_vm7, %v1486_v11, %v1488_v19 }
 0x1f6   : > { %2000 = vmatprep.subr.bf16.mxu0 %v1999_v54  ;;  %2016 = vmatprep.subr.bf16.mxu1 %v2015_v14  ;;  %v1497_v44 = vmul.f32 %v1495_v55, %v2987_v41 }
 0x1f7   : > { %2002 = vmatpush1.bf16.msra.mxu0 %v2001_v23  ;;  %2018 = vmatpush1.bf16.msra.mxu1 %v2017_v58 }
 0x1f8   : > { %v1492_v12 = vpop.permute.xlu1 %1491  ;;  %v1490_v39 = vpop.permute.xlu0 %1489 }
 0x1f9   : > { %v1496_v33 = vsel %vm516_vm7, %v1492_v12, %v1486_v11  ;;  %v1493_v34 = vsel %vm516_vm7, %v1490_v39, %v1492_v12  ;;  %v1494_v37 = vsel %vm516_vm7, %v1488_v19, %v1490_v39 }
 0x1fa   : > { %v1500_v15 = vmul.f32 %v1496_v33, %v2981_v10  ;;  %v1498_v53 = vmul.f32 %v1494_v37, %v2974_v32  ;;  %v1499_v43 = vmul.f32 %v1493_v34, %v2984_v38 }
 0x1fc   : > { %1517 = vmatprep.subr.mxu0 %v1498_v53  ;;  %1600 = vmatprep.subr.mxu1 %v1500_v15 }
 0x1fd   : > { %1518 = vmatpush1.msra.mxu0 %v1497_v44  ;;  %1601 = vmatpush1.msra.mxu1 %v1499_v43 }
 0x1fe   : > { %1866 = vmatmul.mubr.msk.f32.vlgmr.msra.gmra.mrb[18].mxu0 %vm556_vm8, %v3005_v46  ;;  %1869 = vmatmul.mubr.msk.f32.vlgmr.msra.gmra.mrb[18].mxu1 %vm556_vm8, %v3005_v46 }
 0x1ff   : > { %1571 = vmatprep.mubr.f32.mxu0 %v3653_v49  ;;  %1654 = vmatprep.mubr.f32.mxu1 %v3653_v49 }
 0x202   : > { %1867 = vmatmul.mubr.msk.f32.gmra.mrb[20].mxu0 %vm556_vm8, %v3016_v2  ;;  %1870 = vmatmul.mubr.msk.f32.gmra.mrb[20].mxu1 %vm556_vm8, %v3016_v2 }
 0x203   : > { %1577 = vmatprep.mubr.f32.mxu0 %v3653_v49  ;;  %1660 = vmatprep.mubr.f32.mxu1 %v3653_v49 }
 0x206   : > { %1868 = vmatmul.mubr.msk.f32.gmra.mrb[22].mxu0 %vm556_vm8, %v3030_v56  ;;  %1871 = vmatmul.mubr.msk.f32.gmra.mrb[22].mxu1 %vm556_vm8, %v3030_v56 }
 0x209   : > { %v3470_v13 = vpop.permute.xlu0 %543 }
 0x20a   : > { %v3472_v32 = vpop.permute.xlu1 %548 }
 0x20e   : > { %v3488_v5 = vpop.permute.xlu1 %553 }
 0x212   : > { %v632_v10 = vpop.f32.mrb[0].mxu0  ;;  %v715_v38 = vpop.f32.mrb[0].mxu1 }
 0x213   : > { %v633_v41 = vadd.f32 %v632_v10, %v3470_v13  ;;  %v716_v46 = vadd.f32 %v715_v38, %v3470_v13  ;;  %v634_v2 = vpop.f32.mrb[1].mxu0  ;;  %v717_v21 = vpop.f32.mrb[1].mxu1 }
 0x214   : > { %v635_v49 = vadd.f32 %v634_v2, %v3470_v13  ;;  %v718_v25 = vadd.f32 %v717_v21, %v3470_v13 }
 0x215   : > { %732 = vst [vmem:[%s3478_s24] sm:$0xff] %v633_v41  ;;  %734 = vst [vmem:[%s3478_s24 + $0x10] sm:$0xff] %v716_v46 }
 0x216   : > { %733 = vst [vmem:[%s3478_s24 + $0x8] sm:$0xff] %v635_v49  ;;  %735 = vst [vmem:[%s3478_s24 + $0x18] sm:$0xff] %v718_v25  ;;  %v638_v56 = vpop.f32.mrb[2].mxu0  ;;  %v721_v17 = vpop.f32.mrb[2].mxu1 }
 0x217   : > { %v639_v26 = vadd.f32 %v638_v56, %v3472_v32  ;;  %v722_v27 = vadd.f32 %v721_v17, %v3472_v32  ;;  %v640_v36 = vpop.f32.mrb[3].mxu0  ;;  %v723_v7 = vpop.f32.mrb[3].mxu1 }
 0x218   : > { %v641_v16 = vadd.f32 %v640_v36, %v3472_v32  ;;  %v724_v31 = vadd.f32 %v723_v7, %v3472_v32 }
 0x219   : > { %736 = vst [vmem:[%s3478_s24 + $0x20] sm:$0xff] %v639_v26  ;;  %738 = vst [vmem:[%s3478_s24 + $0x30] sm:$0xff] %v722_v27 }
 0x21a   : > { %737 = vst [vmem:[%s3478_s24 + $0x28] sm:$0xff] %v641_v16  ;;  %739 = vst [vmem:[%s3478_s24 + $0x38] sm:$0xff] %v724_v31  ;;  %v644_v50 = vpop.f32.mrb[4].mxu0  ;;  %v727_v4 = vpop.f32.mrb[4].mxu1 }
 0x21b   : > { %v645_v52 = vadd.f32 %v644_v50, %v3488_v5  ;;  %v728_v62 = vadd.f32 %v727_v4, %v3488_v5  ;;  %v646_v48 = vpop.f32.mrb[5].mxu0  ;;  %v729_v29 = vpop.f32.mrb[5].mxu1 }
 0x21c   : > { %v647_v8 = vadd.f32 %v646_v48, %v3488_v5  ;;  %v730_v28 = vadd.f32 %v729_v29, %v3488_v5 }
 0x21d   : > { %740 = vst [vmem:[%s3478_s24 + $0x40] sm:$0xff] %v645_v52  ;;  %742 = vst [vmem:[%s3478_s24 + $0x50] sm:$0xff] %v728_v62 }
 0x21e   : > { %741 = vst [vmem:[%s3478_s24 + $0x48] sm:$0xff] %v647_v8  ;;  %743 = vst [vmem:[%s3478_s24 + $0x58] sm:$0xff] %v730_v28 }
 0x252   : > { %v943_v63 = vpop.f32.mrb[6].mxu0  ;;  %v1026_v35 = vpop.f32.mrb[6].mxu1 }
 0x253   : > { %v944_v18 = vadd.f32 %v943_v63, %v3470_v13  ;;  %v1027_v24 = vadd.f32 %v1026_v35, %v3470_v13  ;;  %v945_v42 = vpop.f32.mrb[7].mxu0  ;;  %v1028_v20 = vpop.f32.mrb[7].mxu1 }
 0x254   : > { %v946_v60 = vadd.f32 %v945_v42, %v3470_v13  ;;  %v1029_v30 = vadd.f32 %v1028_v20, %v3470_v13 }
 0x255   : > { %1828 = vst [vmem:[%s3478_s24 + $0x60] sm:$0xff] %v944_v18  ;;  %1830 = vst [vmem:[%s3478_s24 + $0x70] sm:$0xff] %v1027_v24 }
 0x256   : > { %1829 = vst [vmem:[%s3478_s24 + $0x68] sm:$0xff] %v946_v60  ;;  %1831 = vst [vmem:[%s3478_s24 + $0x78] sm:$0xff] %v1029_v30  ;;  %v949_v59 = vpop.f32.mrb[8].mxu0  ;;  %v1032_v61 = vpop.f32.mrb[8].mxu1 }
 0x257   : > { %v950_v6 = vadd.f32 %v949_v59, %v3472_v32  ;;  %v1033_v3 = vadd.f32 %v1032_v61, %v3472_v32  ;;  %v951_v57 = vpop.f32.mrb[9].mxu0  ;;  %v1034_v40 = vpop.f32.mrb[9].mxu1 }
 0x258   : > { %v952_v47 = vadd.f32 %v951_v57, %v3472_v32  ;;  %v1035_v45 = vadd.f32 %v1034_v40, %v3472_v32 }
 0x259   : > { %1832 = vst [vmem:[%s3478_s24 + $0x80] sm:$0xff] %v950_v6  ;;  %1834 = vst [vmem:[%s3478_s24 + $0x90] sm:$0xff] %v1033_v3 }
 0x25a   : > { %1833 = vst [vmem:[%s3478_s24 + $0x88] sm:$0xff] %v952_v47  ;;  %1835 = vst [vmem:[%s3478_s24 + $0x98] sm:$0xff] %v1035_v45  ;;  %v955_v22 = vpop.f32.mrb[10].mxu0  ;;  %v1038_v51 = vpop.f32.mrb[10].mxu1 }
 0x25b   : > { %v956_v0 = vadd.f32 %v955_v22, %v3488_v5  ;;  %v1039_v1 = vadd.f32 %v1038_v51, %v3488_v5  ;;  %v957_v9 = vpop.f32.mrb[11].mxu0  ;;  %v1040_v58 = vpop.f32.mrb[11].mxu1 }
 0x25c   : > { %v958_v19 = vadd.f32 %v957_v9, %v3488_v5  ;;  %v1041_v11 = vadd.f32 %v1040_v58, %v3488_v5 }
 0x25d   : > { %1836 = vst [vmem:[%s3478_s24 + $0xa0] sm:$0xff] %v956_v0  ;;  %1838 = vst [vmem:[%s3478_s24 + $0xb0] sm:$0xff] %v1039_v1 }
 0x25e   : > { %1837 = vst [vmem:[%s3478_s24 + $0xa8] sm:$0xff] %v958_v19  ;;  %1839 = vst [vmem:[%s3478_s24 + $0xb8] sm:$0xff] %v1041_v11 }
 0x291   : > { %v1255_v54 = vpop.f32.mrb[12].mxu0  ;;  %v1338_v14 = vpop.f32.mrb[12].mxu1 }
 0x292   : > { %v1256_v23 = vadd.f32 %v1255_v54, %v3470_v13  ;;  %v1339_v55 = vadd.f32 %v1338_v14, %v3470_v13  ;;  %v1257_v12 = vpop.f32.mrb[13].mxu0  ;;  %v1340_v39 = vpop.f32.mrb[13].mxu1 }
 0x293   : > { %v1258_v33 = vadd.f32 %v1257_v12, %v3470_v13  ;;  %v1341_v34 = vadd.f32 %v1340_v39, %v3470_v13 }
 0x294   : > { %1850 = vst [vmem:[%s3478_s24 + $0xc0] sm:$0xff] %v1256_v23  ;;  %1852 = vst [vmem:[%s3478_s24 + $0xd0] sm:$0xff] %v1339_v55 }
 0x295   : > { %1851 = vst [vmem:[%s3478_s24 + $0xc8] sm:$0xff] %v1258_v33  ;;  %1853 = vst [vmem:[%s3478_s24 + $0xd8] sm:$0xff] %v1341_v34  ;;  %v1261_v37 = vpop.f32.mrb[14].mxu0  ;;  %v1344_v15 = vpop.f32.mrb[14].mxu1 }
 0x296   : > { %v1262_v53 = vadd.f32 %v1261_v37, %v3472_v32  ;;  %v1345_v43 = vadd.f32 %v1344_v15, %v3472_v32  ;;  %v1263_v44 = vpop.f32.mrb[15].mxu0  ;;  %v1346_v10 = vpop.f32.mrb[15].mxu1 }
 0x297   : > { %v1264_v38 = vadd.f32 %v1263_v44, %v3472_v32  ;;  %v1347_v41 = vadd.f32 %v1346_v10, %v3472_v32 }
 0x298   : > { %1854 = vst [vmem:[%s3478_s24 + $0xe0] sm:$0xff] %v1262_v53  ;;  %1856 = vst [vmem:[%s3478_s24 + $0xf0] sm:$0xff] %v1345_v43 }
 0x299   : > { %1855 = vst [vmem:[%s3478_s24 + $0xe8] sm:$0xff] %v1264_v38  ;;  %1857 = vst [vmem:[%s3478_s24 + $0xf8] sm:$0xff] %v1347_v41  ;;  %v1267_v46 = vpop.f32.mrb[16].mxu0  ;;  %v1350_v2 = vpop.f32.mrb[16].mxu1 }
 0x29a   : > { %v1268_v21 = vadd.f32 %v1267_v46, %v3488_v5  ;;  %v1351_v49 = vadd.f32 %v1350_v2, %v3488_v5  ;;  %v1269_v25 = vpop.f32.mrb[17].mxu0  ;;  %v1352_v56 = vpop.f32.mrb[17].mxu1 }
 0x29b   : > { %v1270_v17 = vadd.f32 %v1269_v25, %v3488_v5  ;;  %v1353_v26 = vadd.f32 %v1352_v56, %v3488_v5 }
 0x29c   : > { %1858 = vst [vmem:[%s3478_s24 + $0x100] sm:$0xff] %v1268_v21  ;;  %1860 = vst [vmem:[%s3478_s24 + $0x110] sm:$0xff] %v1351_v49 }
 0x29d   : > { %1859 = vst [vmem:[%s3478_s24 + $0x108] sm:$0xff] %v1270_v17  ;;  %1861 = vst [vmem:[%s3478_s24 + $0x118] sm:$0xff] %v1353_v26 }
 0x2d1   : > { %v1567_v27 = vpop.f32.mrb[18].mxu0  ;;  %v1650_v36 = vpop.f32.mrb[18].mxu1 }
 0x2d2   : > { %v1568_v7 = vadd.f32 %v1567_v27, %v3470_v13  ;;  %v1651_v16 = vadd.f32 %v1650_v36, %v3470_v13  ;;  %v1569_v31 = vpop.f32.mrb[19].mxu0  ;;  %v1652_v50 = vpop.f32.mrb[19].mxu1 }
 0x2d3   : > { %v1570_v4 = vadd.f32 %v1569_v31, %v3470_v13  ;;  %v1653_v52 = vadd.f32 %v1652_v50, %v3470_v13 }
 0x2d4   : > { %1872 = vst [vmem:[%s3478_s24 + $0x120] sm:$0xff] %v1568_v7  ;;  %1874 = vst [vmem:[%s3478_s24 + $0x130] sm:$0xff] %v1651_v16 }
 0x2d5   : > { %1873 = vst [vmem:[%s3478_s24 + $0x128] sm:$0xff] %v1570_v4  ;;  %1875 = vst [vmem:[%s3478_s24 + $0x138] sm:$0xff] %v1653_v52  ;;  %v1573_v62 = vpop.f32.mrb[20].mxu0  ;;  %v1656_v48 = vpop.f32.mrb[20].mxu1 }
 0x2d6   : > { %v1574_v29 = vadd.f32 %v1573_v62, %v3472_v32  ;;  %v1657_v8 = vadd.f32 %v1656_v48, %v3472_v32  ;;  %v1575_v28 = vpop.f32.mrb[21].mxu0  ;;  %v1658_v63 = vpop.f32.mrb[21].mxu1 }
 0x2d7   : > { %v1576_v35 = vadd.f32 %v1575_v28, %v3472_v32  ;;  %v1659_v13 = vadd.f32 %v1658_v63, %v3472_v32 }
 0x2d8   : > { %1876 = vst [vmem:[%s3478_s24 + $0x140] sm:$0xff] %v1574_v29  ;;  %1878 = vst [vmem:[%s3478_s24 + $0x150] sm:$0xff] %v1657_v8 }
 0x2d9   : > { %1877 = vst [vmem:[%s3478_s24 + $0x148] sm:$0xff] %v1576_v35  ;;  %1879 = vst [vmem:[%s3478_s24 + $0x158] sm:$0xff] %v1659_v13  ;;  %v1579_v18 = vpop.f32.mrb[22].mxu0  ;;  %v1662_v24 = vpop.f32.mrb[22].mxu1 }
 0x2da   : > { %v1580_v42 = vadd.f32 %v1579_v18, %v3488_v5  ;;  %v1663_v20 = vadd.f32 %v1662_v24, %v3488_v5  ;;  %v1581_v60 = vpop.f32.mrb[23].mxu0  ;;  %v1664_v30 = vpop.f32.mrb[23].mxu1 }
 0x2db   : > { %v1582_v32 = vadd.f32 %v1581_v60, %v3488_v5  ;;  %v1665_v59 = vadd.f32 %v1664_v30, %v3488_v5 }
 0x2dc   : > { %1880 = vst [vmem:[%s3478_s24 + $0x160] sm:$0xff] %v1580_v42  ;;  %1882 = vst [vmem:[%s3478_s24 + $0x170] sm:$0xff] %v1663_v20 }
 0x2dd   : > { %1881 = vst [vmem:[%s3478_s24 + $0x168] sm:$0xff] %v1582_v32  ;;  %1883 = vst [vmem:[%s3478_s24 + $0x178] sm:$0xff] %v1665_v59 }
 0x2de   : > { %2243 = shalt.err (!%p2240_p4)
}
 0x2df   : > { %s2244_s6 = scalar_lea.hbm %s3573_s14, 6144  ;;  %s2248_s13 = scalar_lea.hbm %s3629_s4, 12288 }
 0x2e0   : > { %p2245_p9 = scmp.ne.s32.totalorder %s3573_s14, %s2244_s6  ;;  %p2249_p8 = scmp.lt.u32.totalorder %s3573_s14, %s3629_s4 }
 0x2e1   : > { %p2250_p13 = scmp.lt.u32.totalorder %s2248_s13, %s2244_s6  ;;  %p2252_p10 = scmp.lt.u32.totalorder %s2244_s6, %s3573_s14 }
 0x2e2   : > { %p2246_p0 = pnand %p2245_p9, %p2497_p5 }
 0x2e3   : > { %p2251_p6 = por %p2250_p13, %p2249_p8 }
 0x2e4   : > { %p2247_p11 = pneg %p2246_p0 }
 0x2e5   : > { %p2253_p3 = por %p2252_p10, %p2251_p6 }
 0x2e7   : > { %p2254_p7 = pnand %p2253_p3, %p2247_p11 }
 0x2e9   : > { %2257 = shalt.err (!%p2254_p7)
}
 0x2ea   : > { %s2325_s24 = smov 512   ;;  %s2326_s27 = smov 32  }
 0x2eb   : > { %2035 = dma.vmem_to_hbm [thread:$0]  (%p2497_p5), %s3575_s5, 6144, %s3573_s14, %s1681_s20, %s2325_s24, %s2325_s24, %s2326_s27  }
 0x2ec PF: > { %s1710_s19 = sand.u32 1, %s2292_s15   ;;  %p3656_p12 = scmp.ne.s32.totalorder %s3638_s22, 0 }
 0x2ed   : > { %p3657_p2 = scmp.ge.s32.totalorder %s2304_s18, 2  ;;  %s1711_s9 = scalar_lea.sflag [#allocation4], %s1710_s19 }
 0x2ef   : > { %p2052_p1 = pnand %p3657_p2, %p3656_p12 }
 0x2f1   : > { %2287 = dma.done.wait (!%p2052_p1), %s1711_s9, 6144  }
 0x2f2   : > { %2289 = vsyncadd (!%p2052_p1), %s1711_s9, 4294961152  ;;  %p19_p4 = scmp.ge.s32.totalorder %s2483_s10, 4   ;;  %s3658_s15 = smov %s2296_s16 }
 0x2f3   : > { %s3659_s16 = smov %s2300_s17  ;;  %s3660_s17 = smov %s2493_s11 }
 0x2f4   : > { %s3661_s18 = smov %s2483_s10  ;;  %21 = sbr.rel (!%p19_p4) target bundleno = 7 (0x7), region = 99 }
 0x2fb   :  { %1716 = vsyncpa [#allocation3], 1 }
 0x2fc   :  { %1718 = vsyncpa [#allocation3 + $0x1], 1 }
 0x2fd   :  { %1719 = vsyncpa [#allocation6], 1 }
 0x2fe   :  { %1720 = vsyncpa [#allocation9], 1 }
 0x2ff   :  { %1721 = vsyncpa [#allocation4], 1 }
 0x300   :  { %1723 = vsyncpa [#allocation4 + $0x1], 1 }

</bundles_post_ra>
